<compile_context>
chip_gen: v5e
topology: v5e:2x2
jax: 0.10.0
libtpu: 0.0.40
codegen_flags: <defaults>
</compile_context>

<pallas_src>
import functools

import jax
import jax.numpy as jnp
from jax.experimental import pallas as pl
from jax.experimental.pallas import tpu as pltpu

# ---- problem sizes (small, consistent with the module) ----
D_MODEL = 32
N_HEADS = 4
MLP_SCALE = 4
SEQ = 8
BATCH = 2

D_HEAD = D_MODEL // N_HEADS
D_HIDDEN = D_MODEL * MLP_SCALE          # 128
LN_EPS = 1e-5
LANES = 128


def _layer_norm(v, w, b, inv_dim):
    """PyTorch LayerNorm (biased variance, eps=1e-5), one-pass sums."""
    s1 = jnp.sum(v, axis=-1, keepdims=True)
    s2 = jnp.sum(v * v, axis=-1, keepdims=True)
    mu = s1 * inv_dim
    var = s2 * inv_dim - mu * mu
    return (v - mu) * jax.lax.rsqrt(var + LN_EPS) * w + b


def _tblock_kernel(x_ref,
                   wq_ref, wk_ref, wv_ref,          # (H, E, Dh) each; q pre-scaled
                   wo_ref,                          # (H, Dh, E)
                   ln_pa_w_ref, ln_pa_b_ref,        # pre_attn_layer_norm
                   ln_po_w_ref, ln_po_b_ref,        # post_attn_layer_norm
                   ln_pm_w_ref, ln_pm_b_ref,        # pre_mlp_layer_norm
                   w1_ref,                          # (E, 2*D_HIDDEN)
                   ln_h_w_ref, ln_h_b_ref,          # mlp LayerNorm(d_model*mlp_scale)
                   w2_ref,                          # (D_HIDDEN, E)
                   out_ref, *, n_batch, seq_len):
    R, E = x_ref.shape                              # R = n_batch * seq_len, batch-major rows
    inv_e = 1.0 / E
    x = x_ref[...]                                  # (R, E)

    # ---------------- attention branch ----------------
    h = _layer_norm(x, ln_pa_w_ref[...], ln_pa_b_ref[...], inv_e)

    # Per-head projections straight off the MXU: each dot yields a lane-aligned
    # (R, Dh) tile, split per batch element with tile-aligned row slices and
    # stacked along a new leading (batch*head) dim -- no cross-lane shuffles.
    q_list, k_list, v_list = [], [], []
    for hd in range(N_HEADS):
        qf = jnp.dot(h, wq_ref[hd], preferred_element_type=jnp.float32)   # (R, Dh)
        kf = jnp.dot(h, wk_ref[hd], preferred_element_type=jnp.float32)
        vf = jnp.dot(h, wv_ref[hd], preferred_element_type=jnp.float32)
        for n in range(n_batch):
            rows = slice(n * seq_len, (n + 1) * seq_len)
            q_list.append(qf[rows])
            k_list.append(kf[rows])
            v_list.append(vf[rows])
    q = jnp.stack(q_list, axis=0)                   # (H*N, L, Dh)
    k = jnp.stack(k_list, axis=0)
    v = jnp.stack(v_list, axis=0)

    # Batched attention per (head, batch) -- no cross-batch mask needed.
    s = jnp.einsum("bld,bmd->blm", q, k, preferred_element_type=jnp.float32)
    m = jnp.max(s, axis=-1, keepdims=True)
    e = jnp.exp(s - m)
    den = jnp.sum(e, axis=-1, keepdims=True)
    p = e * pl.reciprocal(den, approx=False)        # exact softmax normalization
    o = jnp.einsum("blm,bmd->bld", p, v, preferred_element_type=jnp.float32)   # (H*N, L, Dh)

    # Fold head-concat + Wo into per-head dots that are summed (MXU, not XLU).
    attn_out = None
    for hd in range(N_HEADS):
        o_h = jnp.concatenate([o[hd * n_batch + n] for n in range(n_batch)],
                              axis=0)                                           # (R, Dh)
        contrib = jnp.dot(o_h, wo_ref[hd], preferred_element_type=jnp.float32)  # (R, E)
        attn_out = contrib if attn_out is None else attn_out + contrib

    x1 = x + _layer_norm(attn_out, ln_po_w_ref[...], ln_po_b_ref[...], inv_e)

    # ---------------- MLP branch ----------------
    h2 = _layer_norm(x1, ln_pm_w_ref[...], ln_pm_b_ref[...], inv_e)
    u = jnp.dot(h2, w1_ref[...], preferred_element_type=jnp.float32)   # (R, 2*D_HIDDEN)
    a = u[:, :D_HIDDEN]
    g = u[:, D_HIDDEN:]
    sw = a * (g * jax.nn.sigmoid(g))                # SwiGLU: silu(gate) * x
    hn = _layer_norm(sw, ln_h_w_ref[...], ln_h_b_ref[...], 1.0 / D_HIDDEN)
    y = x1 + jnp.dot(hn, w2_ref[...], preferred_element_type=jnp.float32)   # (R, E)

    # Lane-dense store: pack (R, E) into a (R*E/128, 128) slab so the final
    # store is an unmasked full-width vst (wrapper undoes the packing).
    lane_groups = LANES // E                        # 4 row-groups per 128-lane row
    rows_per_group = R // lane_groups
    slab = jnp.concatenate(
        [y[g * rows_per_group:(g + 1) * rows_per_group, :]
         for g in range(lane_groups)], axis=1)      # (rows_per_group, 128)
    out_ref[...] = slab


@jax.jit
def transformer_block(x_lne, kparams):
    """x_lne: (L, N, E) float32 (PyTorch MHA default layout), kparams: dict."""
    L, N, E = x_lne.shape
    R = L * N
    assert (R * E) % LANES == 0 and R % (LANES // E) == 0

    # batch-major rows: (L, N, E) -> (N, L, E) -> (R, E)
    x2 = jnp.transpose(x_lne, (1, 0, 2)).reshape(R, E)

    flat_names = ("wq_h", "wk_h", "wv_h", "wo_h",
                  "ln_pa_w", "ln_pa_b", "ln_po_w", "ln_po_b",
                  "ln_pm_w", "ln_pm_b",
                  "w1_t", "ln_h_w", "ln_h_b", "w2_t")
    flat = [kparams[name] for name in flat_names]

    lane_groups = LANES // E
    rows_per_group = R // lane_groups

    slab = pl.pallas_call(
        functools.partial(_tblock_kernel, n_batch=N, seq_len=L),
        out_shape=jax.ShapeDtypeStruct((rows_per_group, LANES), jnp.float32),
        in_specs=[pl.BlockSpec(memory_space=pltpu.MemorySpace.VMEM)
                  for _ in range(1 + len(flat))],
        out_specs=pl.BlockSpec(memory_space=pltpu.MemorySpace.VMEM),
    )(x2, *flat)

    # undo the lane-dense packing, then back to (L, N, E)
    y2 = jnp.concatenate([slab[:, g * E:(g + 1) * E] for g in range(lane_groups)],
                         axis=0)                     # (R, E)
    return jnp.transpose(y2.reshape(N, L, E), (1, 0, 2))


# ---------------- parameter construction & prep ----------------
def _make_params(key):
    """Raw PyTorch-layout parameters."""
    ks = jax.random.split(key, 12)
    E, H2 = D_MODEL, D_HIDDEN
    # nn.MultiheadAttention(bias=False): in_proj_weight (3E, E), out_proj (E, E)
    in_proj = 0.05 * jax.random.normal(ks[0], (3 * E, E), jnp.float32)
    out_proj = 0.05 * jax.random.normal(ks[1], (E, E), jnp.float32)
    # mlp[0]: Linear(E, 2*H2, bias=False) -> weight (2*H2, E)
    w1 = 0.05 * jax.random.normal(ks[2], (2 * H2, E), jnp.float32)
    # mlp[3]: Linear(H2, E, bias=False) -> weight (E, H2)
    w2 = 0.05 * jax.random.normal(ks[3], (E, H2), jnp.float32)

    def ln(kw, kb, dim):
        w = 1.0 + 0.1 * jax.random.normal(kw, (dim,), jnp.float32)
        b = 0.05 * jax.random.normal(kb, (dim,), jnp.float32)
        return w, b

    ln_pa_w, ln_pa_b = ln(ks[4], ks[5], E)
    ln_po_w, ln_po_b = ln(ks[6], ks[7], E)
    ln_pm_w, ln_pm_b = ln(ks[8], ks[9], E)
    ln_h_w, ln_h_b = ln(ks[10], ks[11], H2)

    return dict(in_proj=in_proj, out_proj=out_proj, w1=w1, w2=w2,
                ln_pa_w=ln_pa_w, ln_pa_b=ln_pa_b,
                ln_po_w=ln_po_w, ln_po_b=ln_po_b,
                ln_pm_w=ln_pm_w, ln_pm_b=ln_pm_b,
                ln_h_w=ln_h_w, ln_h_b=ln_h_b)


def _prepare_kernel_params(p):
    """One-time host-side transform into kernel layout (heads pre-split,
    q-scale folded into wq)."""
    E, H, Dh = D_MODEL, N_HEADS, D_HEAD
    in_proj = p["in_proj"]

    def split_heads(w, scale=1.0):
        # w: (E_out, E_in); y = x @ w.T; split output features per head.
        wt = (w * scale).T                              # (E_in, E_out)
        return wt.reshape(E, H, Dh).transpose(1, 0, 2)  # (H, E, Dh)

    def row(v):
        return v.reshape(1, -1)

    return dict(
        wq_h=split_heads(in_proj[:E], Dh ** -0.5),      # scale folded into q weights
        wk_h=split_heads(in_proj[E:2 * E]),
        wv_h=split_heads(in_proj[2 * E:]),
        wo_h=p["out_proj"].T.reshape(H, Dh, E),
        w1_t=p["w1"].T, w2_t=p["w2"].T,
        ln_pa_w=row(p["ln_pa_w"]), ln_pa_b=row(p["ln_pa_b"]),
        ln_po_w=row(p["ln_po_w"]), ln_po_b=row(p["ln_po_b"]),
        ln_pm_w=row(p["ln_pm_w"]), ln_pm_b=row(p["ln_pm_b"]),
        ln_h_w=row(p["ln_h_w"]), ln_h_b=row(p["ln_h_b"]),
    )


# ---------------- pure-JAX reference (PyTorch semantics, raw params) ----------------
def _ln_ref(v, w, b):
    mu = jnp.mean(v, axis=-1, keepdims=True)
    var = jnp.mean((v - mu) ** 2, axis=-1, keepdims=True)
    return (v - mu) * jax.lax.rsqrt(var + LN_EPS) * w + b


def _ref_one(xe, p):
    E, H, Dh = D_MODEL, N_HEADS, D_HEAD
    in_proj = p["in_proj"]
    h = _ln_ref(xe, p["ln_pa_w"], p["ln_pa_b"])
    q = h @ in_proj[:E].T
    k = h @ in_proj[E:2 * E].T
    v = h @ in_proj[2 * E:].T
    L = xe.shape[0]
    qh = q.reshape(L, H, Dh) * (Dh ** -0.5)
    kh = k.reshape(L, H, Dh)
    vh = v.reshape(L, H, Dh)
    s = jnp.einsum("lhd,mhd->hlm", qh, kh)
    pa = jax.nn.softmax(s, axis=-1)
    o = jnp.einsum("hlm,mhd->lhd", pa, vh).reshape(L, E)
    attn_out = o @ p["out_proj"].T
    x1 = xe + _ln_ref(attn_out, p["ln_po_w"], p["ln_po_b"])
    h2 = _ln_ref(x1, p["ln_pm_w"], p["ln_pm_b"])
    u = h2 @ p["w1"].T
    a, g = u[:, :D_HIDDEN], u[:, D_HIDDEN:]
    sw = jax.nn.silu(g) * a
    hn = _ln_ref(sw, p["ln_h_w"], p["ln_h_b"])
    return x1 + hn @ p["w2"].T


if __name__ == "__main__":
    key = jax.random.PRNGKey(0)
    kx, kp = jax.random.split(key)
    # PyTorch MultiheadAttention default layout: (seq, batch, d_model)
    x = jax.random.normal(kx, (SEQ, BATCH, D_MODEL), jnp.float32)
    raw_params = _make_params(kp)
    kparams = _prepare_kernel_params(raw_params)

    out = transformer_block(x, kparams)
    out = jax.block_until_ready(out)

    # sanity check against a pure-JAX reference of the same math
    ref = jnp.stack([_ref_one(x[:, b, :], raw_params) for b in range(BATCH)], axis=1)
    assert out.shape == x.shape
    assert jnp.allclose(out, ref, rtol=2e-2, atol=2e-2), "mismatch vs reference"

    print("KERNEL_OK")
</pallas_src>

<mosaic_0001>
module attributes {stable_mosaic.version = 11 : i64} {
  func.func @_tblock_kernel(%arg0: memref<16x32xf32, #tpu.memory_space<vmem>>, %arg1: memref<4x32x8xf32, #tpu.memory_space<vmem>>, %arg2: memref<4x32x8xf32, #tpu.memory_space<vmem>>, %arg3: memref<4x32x8xf32, #tpu.memory_space<vmem>>, %arg4: memref<4x8x32xf32, #tpu.memory_space<vmem>>, %arg5: memref<1x32xf32, #tpu.memory_space<vmem>>, %arg6: memref<1x32xf32, #tpu.memory_space<vmem>>, %arg7: memref<1x32xf32, #tpu.memory_space<vmem>>, %arg8: memref<1x32xf32, #tpu.memory_space<vmem>>, %arg9: memref<1x32xf32, #tpu.memory_space<vmem>>, %arg10: memref<1x32xf32, #tpu.memory_space<vmem>>, %arg11: memref<32x256xf32, #tpu.memory_space<vmem>>, %arg12: memref<1x128xf32, #tpu.memory_space<vmem>>, %arg13: memref<1x128xf32, #tpu.memory_space<vmem>>, %arg14: memref<128x32xf32, #tpu.memory_space<vmem>>, %arg15: memref<4x128xf32, #tpu.memory_space<vmem>>) attributes {dimension_semantics = [], scalar_prefetch = 0 : i64, scratch_operands = 0 : i64, tpu.core_type = #tpu.core_type<tc>} {
    %c0 = arith.constant 0 : index
    %c0_0 = arith.constant 0 : index
    %0 = vector.load %arg0[%c0, %c0_0] : memref<16x32xf32, #tpu.memory_space<vmem>>, vector<16x32xf32>
    %c0_1 = arith.constant 0 : index
    %c0_2 = arith.constant 0 : index
    %1 = vector.load %arg5[%c0_1, %c0_2] : memref<1x32xf32, #tpu.memory_space<vmem>>, vector<1x32xf32>
    %c0_3 = arith.constant 0 : index
    %c0_4 = arith.constant 0 : index
    %2 = vector.load %arg6[%c0_3, %c0_4] : memref<1x32xf32, #tpu.memory_space<vmem>>, vector<1x32xf32>
    %cst = arith.constant dense<0.000000e+00> : vector<16xf32>
    %3 = vector.multi_reduction <add>, %0, %cst [1] : vector<16x32xf32> to vector<16xf32>
    %4 = vector.shape_cast %3 : vector<16xf32> to vector<16x1xf32>
    %5 = arith.mulf %0, %0 : vector<16x32xf32>
    %cst_5 = arith.constant dense<0.000000e+00> : vector<16xf32>
    %6 = vector.multi_reduction <add>, %5, %cst_5 [1] : vector<16x32xf32> to vector<16xf32>
    %7 = vector.shape_cast %6 : vector<16xf32> to vector<16x1xf32>
    %cst_6 = arith.constant 3.125000e-02 : f32
    %8 = vector.broadcast %cst_6 : f32 to vector<16x1xf32>
    %9 = arith.mulf %4, %8 : vector<16x1xf32>
    %cst_7 = arith.constant 3.125000e-02 : f32
    %10 = vector.broadcast %cst_7 : f32 to vector<16x1xf32>
    %11 = arith.mulf %7, %10 : vector<16x1xf32>
    %12 = arith.mulf %9, %9 : vector<16x1xf32>
    %13 = arith.subf %11, %12 : vector<16x1xf32>
    %14 = vector.broadcast %9 : vector<16x1xf32> to vector<16x32xf32>
    %15 = arith.subf %0, %14 : vector<16x32xf32>
    %cst_8 = arith.constant 9.99999974E-6 : f32
    %16 = vector.broadcast %cst_8 : f32 to vector<16x1xf32>
    %17 = arith.addf %13, %16 : vector<16x1xf32>
    %18 = math.rsqrt %17 : vector<16x1xf32>
    %19 = vector.broadcast %18 : vector<16x1xf32> to vector<16x32xf32>
    %20 = arith.mulf %15, %19 : vector<16x32xf32>
    %21 = vector.broadcast %1 : vector<1x32xf32> to vector<16x32xf32>
    %22 = arith.mulf %20, %21 : vector<16x32xf32>
    %23 = vector.broadcast %2 : vector<1x32xf32> to vector<16x32xf32>
    %24 = arith.addf %22, %23 : vector<16x32xf32>
    %c0_9 = arith.constant 0 : index
    %c0_10 = arith.constant 0 : index
    %c0_11 = arith.constant 0 : index
    %25 = vector.load %arg1[%c0_9, %c0_10, %c0_11] : memref<4x32x8xf32, #tpu.memory_space<vmem>>, vector<1x32x8xf32>
    %26 = vector.shape_cast %25 : vector<1x32x8xf32> to vector<32x8xf32>
    %cst_12 = arith.constant dense<0.000000e+00> : vector<16x8xf32>
    %27 = tpu.matmul %24, %26, %cst_12 {dimension_numbers = #tpu.dot_dimension_numbers<[1], [0], [0], [1], [0, 0, 1, 1], [], []>} : vector<16x32xf32>, vector<32x8xf32>, vector<16x8xf32> -> vector<16x8xf32>
    %c0_13 = arith.constant 0 : index
    %c0_14 = arith.constant 0 : index
    %c0_15 = arith.constant 0 : index
    %28 = vector.load %arg2[%c0_13, %c0_14, %c0_15] : memref<4x32x8xf32, #tpu.memory_space<vmem>>, vector<1x32x8xf32>
    %29 = vector.shape_cast %28 : vector<1x32x8xf32> to vector<32x8xf32>
    %cst_16 = arith.constant dense<0.000000e+00> : vector<16x8xf32>
    %30 = tpu.matmul %24, %29, %cst_16 {dimension_numbers = #tpu.dot_dimension_numbers<[1], [0], [0], [1], [0, 0, 1, 1], [], []>} : vector<16x32xf32>, vector<32x8xf32>, vector<16x8xf32> -> vector<16x8xf32>
    %c0_17 = arith.constant 0 : index
    %c0_18 = arith.constant 0 : index
    %c0_19 = arith.constant 0 : index
    %31 = vector.load %arg3[%c0_17, %c0_18, %c0_19] : memref<4x32x8xf32, #tpu.memory_space<vmem>>, vector<1x32x8xf32>
    %32 = vector.shape_cast %31 : vector<1x32x8xf32> to vector<32x8xf32>
    %cst_20 = arith.constant dense<0.000000e+00> : vector<16x8xf32>
    %33 = tpu.matmul %24, %32, %cst_20 {dimension_numbers = #tpu.dot_dimension_numbers<[1], [0], [0], [1], [0, 0, 1, 1], [], []>} : vector<16x32xf32>, vector<32x8xf32>, vector<16x8xf32> -> vector<16x8xf32>
    %34 = vector.extract_strided_slice %27 {offsets = [0, 0], sizes = [8, 8], strides = [1, 1]} : vector<16x8xf32> to vector<8x8xf32>
    %35 = vector.extract_strided_slice %30 {offsets = [0, 0], sizes = [8, 8], strides = [1, 1]} : vector<16x8xf32> to vector<8x8xf32>
    %36 = vector.extract_strided_slice %33 {offsets = [0, 0], sizes = [8, 8], strides = [1, 1]} : vector<16x8xf32> to vector<8x8xf32>
    %37 = vector.extract_strided_slice %27 {offsets = [8, 0], sizes = [8, 8], strides = [1, 1]} : vector<16x8xf32> to vector<8x8xf32>
    %38 = vector.extract_strided_slice %30 {offsets = [8, 0], sizes = [8, 8], strides = [1, 1]} : vector<16x8xf32> to vector<8x8xf32>
    %39 = vector.extract_strided_slice %33 {offsets = [8, 0], sizes = [8, 8], strides = [1, 1]} : vector<16x8xf32> to vector<8x8xf32>
    %c1 = arith.constant 1 : index
    %c0_21 = arith.constant 0 : index
    %c0_22 = arith.constant 0 : index
    %40 = vector.load %arg1[%c1, %c0_21, %c0_22] : memref<4x32x8xf32, #tpu.memory_space<vmem>>, vector<1x32x8xf32>
    %41 = vector.shape_cast %40 : vector<1x32x8xf32> to vector<32x8xf32>
    %cst_23 = arith.constant dense<0.000000e+00> : vector<16x8xf32>
    %42 = tpu.matmul %24, %41, %cst_23 {dimension_numbers = #tpu.dot_dimension_numbers<[1], [0], [0], [1], [0, 0, 1, 1], [], []>} : vector<16x32xf32>, vector<32x8xf32>, vector<16x8xf32> -> vector<16x8xf32>
    %c1_24 = arith.constant 1 : index
    %c0_25 = arith.constant 0 : index
    %c0_26 = arith.constant 0 : index
    %43 = vector.load %arg2[%c1_24, %c0_25, %c0_26] : memref<4x32x8xf32, #tpu.memory_space<vmem>>, vector<1x32x8xf32>
    %44 = vector.shape_cast %43 : vector<1x32x8xf32> to vector<32x8xf32>
    %cst_27 = arith.constant dense<0.000000e+00> : vector<16x8xf32>
    %45 = tpu.matmul %24, %44, %cst_27 {dimension_numbers = #tpu.dot_dimension_numbers<[1], [0], [0], [1], [0, 0, 1, 1], [], []>} : vector<16x32xf32>, vector<32x8xf32>, vector<16x8xf32> -> vector<16x8xf32>
    %c1_28 = arith.constant 1 : index
    %c0_29 = arith.constant 0 : index
    %c0_30 = arith.constant 0 : index
    %46 = vector.load %arg3[%c1_28, %c0_29, %c0_30] : memref<4x32x8xf32, #tpu.memory_space<vmem>>, vector<1x32x8xf32>
    %47 = vector.shape_cast %46 : vector<1x32x8xf32> to vector<32x8xf32>
    %cst_31 = arith.constant dense<0.000000e+00> : vector<16x8xf32>
    %48 = tpu.matmul %24, %47, %cst_31 {dimension_numbers = #tpu.dot_dimension_numbers<[1], [0], [0], [1], [0, 0, 1, 1], [], []>} : vector<16x32xf32>, vector<32x8xf32>, vector<16x8xf32> -> vector<16x8xf32>
    %49 = vector.extract_strided_slice %42 {offsets = [0, 0], sizes = [8, 8], strides = [1, 1]} : vector<16x8xf32> to vector<8x8xf32>
    %50 = vector.extract_strided_slice %45 {offsets = [0, 0], sizes = [8, 8], strides = [1, 1]} : vector<16x8xf32> to vector<8x8xf32>
    %51 = vector.extract_strided_slice %48 {offsets = [0, 0], sizes = [8, 8], strides = [1, 1]} : vector<16x8xf32> to vector<8x8xf32>
    %52 = vector.extract_strided_slice %42 {offsets = [8, 0], sizes = [8, 8], strides = [1, 1]} : vector<16x8xf32> to vector<8x8xf32>
    %53 = vector.extract_strided_slice %45 {offsets = [8, 0], sizes = [8, 8], strides = [1, 1]} : vector<16x8xf32> to vector<8x8xf32>
    %54 = vector.extract_strided_slice %48 {offsets = [8, 0], sizes = [8, 8], strides = [1, 1]} : vector<16x8xf32> to vector<8x8xf32>
    %c2 = arith.constant 2 : index
    %c0_32 = arith.constant 0 : index
    %c0_33 = arith.constant 0 : index
    %55 = vector.load %arg1[%c2, %c0_32, %c0_33] : memref<4x32x8xf32, #tpu.memory_space<vmem>>, vector<1x32x8xf32>
    %56 = vector.shape_cast %55 : vector<1x32x8xf32> to vector<32x8xf32>
    %cst_34 = arith.constant dense<0.000000e+00> : vector<16x8xf32>
    %57 = tpu.matmul %24, %56, %cst_34 {dimension_numbers = #tpu.dot_dimension_numbers<[1], [0], [0], [1], [0, 0, 1, 1], [], []>} : vector<16x32xf32>, vector<32x8xf32>, vector<16x8xf32> -> vector<16x8xf32>
    %c2_35 = arith.constant 2 : index
    %c0_36 = arith.constant 0 : index
    %c0_37 = arith.constant 0 : index
    %58 = vector.load %arg2[%c2_35, %c0_36, %c0_37] : memref<4x32x8xf32, #tpu.memory_space<vmem>>, vector<1x32x8xf32>
    %59 = vector.shape_cast %58 : vector<1x32x8xf32> to vector<32x8xf32>
    %cst_38 = arith.constant dense<0.000000e+00> : vector<16x8xf32>
    %60 = tpu.matmul %24, %59, %cst_38 {dimension_numbers = #tpu.dot_dimension_numbers<[1], [0], [0], [1], [0, 0, 1, 1], [], []>} : vector<16x32xf32>, vector<32x8xf32>, vector<16x8xf32> -> vector<16x8xf32>
    %c2_39 = arith.constant 2 : index
    %c0_40 = arith.constant 0 : index
    %c0_41 = arith.constant 0 : index
    %61 = vector.load %arg3[%c2_39, %c0_40, %c0_41] : memref<4x32x8xf32, #tpu.memory_space<vmem>>, vector<1x32x8xf32>
    %62 = vector.shape_cast %61 : vector<1x32x8xf32> to vector<32x8xf32>
    %cst_42 = arith.constant dense<0.000000e+00> : vector<16x8xf32>
    %63 = tpu.matmul %24, %62, %cst_42 {dimension_numbers = #tpu.dot_dimension_numbers<[1], [0], [0], [1], [0, 0, 1, 1], [], []>} : vector<16x32xf32>, vector<32x8xf32>, vector<16x8xf32> -> vector<16x8xf32>
    %64 = vector.extract_strided_slice %57 {offsets = [0, 0], sizes = [8, 8], strides = [1, 1]} : vector<16x8xf32> to vector<8x8xf32>
    %65 = vector.extract_strided_slice %60 {offsets = [0, 0], sizes = [8, 8], strides = [1, 1]} : vector<16x8xf32> to vector<8x8xf32>
    %66 = vector.extract_strided_slice %63 {offsets = [0, 0], sizes = [8, 8], strides = [1, 1]} : vector<16x8xf32> to vector<8x8xf32>
    %67 = vector.extract_strided_slice %57 {offsets = [8, 0], sizes = [8, 8], strides = [1, 1]} : vector<16x8xf32> to vector<8x8xf32>
    %68 = vector.extract_strided_slice %60 {offsets = [8, 0], sizes = [8, 8], strides = [1, 1]} : vector<16x8xf32> to vector<8x8xf32>
    %69 = vector.extract_strided_slice %63 {offsets = [8, 0], sizes = [8, 8], strides = [1, 1]} : vector<16x8xf32> to vector<8x8xf32>
    %c3 = arith.constant 3 : index
    %c0_43 = arith.constant 0 : index
    %c0_44 = arith.constant 0 : index
    %70 = vector.load %arg1[%c3, %c0_43, %c0_44] : memref<4x32x8xf32, #tpu.memory_space<vmem>>, vector<1x32x8xf32>
    %71 = vector.shape_cast %70 : vector<1x32x8xf32> to vector<32x8xf32>
    %cst_45 = arith.constant dense<0.000000e+00> : vector<16x8xf32>
    %72 = tpu.matmul %24, %71, %cst_45 {dimension_numbers = #tpu.dot_dimension_numbers<[1], [0], [0], [1], [0, 0, 1, 1], [], []>} : vector<16x32xf32>, vector<32x8xf32>, vector<16x8xf32> -> vector<16x8xf32>
    %c3_46 = arith.constant 3 : index
    %c0_47 = arith.constant 0 : index
    %c0_48 = arith.constant 0 : index
    %73 = vector.load %arg2[%c3_46, %c0_47, %c0_48] : memref<4x32x8xf32, #tpu.memory_space<vmem>>, vector<1x32x8xf32>
    %74 = vector.shape_cast %73 : vector<1x32x8xf32> to vector<32x8xf32>
    %cst_49 = arith.constant dense<0.000000e+00> : vector<16x8xf32>
    %75 = tpu.matmul %24, %74, %cst_49 {dimension_numbers = #tpu.dot_dimension_numbers<[1], [0], [0], [1], [0, 0, 1, 1], [], []>} : vector<16x32xf32>, vector<32x8xf32>, vector<16x8xf32> -> vector<16x8xf32>
    %c3_50 = arith.constant 3 : index
    %c0_51 = arith.constant 0 : index
    %c0_52 = arith.constant 0 : index
    %76 = vector.load %arg3[%c3_50, %c0_51, %c0_52] : memref<4x32x8xf32, #tpu.memory_space<vmem>>, vector<1x32x8xf32>
    %77 = vector.shape_cast %76 : vector<1x32x8xf32> to vector<32x8xf32>
    %cst_53 = arith.constant dense<0.000000e+00> : vector<16x8xf32>
    %78 = tpu.matmul %24, %77, %cst_53 {dimension_numbers = #tpu.dot_dimension_numbers<[1], [0], [0], [1], [0, 0, 1, 1], [], []>} : vector<16x32xf32>, vector<32x8xf32>, vector<16x8xf32> -> vector<16x8xf32>
    %79 = vector.extract_strided_slice %72 {offsets = [0, 0], sizes = [8, 8], strides = [1, 1]} : vector<16x8xf32> to vector<8x8xf32>
    %80 = vector.extract_strided_slice %75 {offsets = [0, 0], sizes = [8, 8], strides = [1, 1]} : vector<16x8xf32> to vector<8x8xf32>
    %81 = vector.extract_strided_slice %78 {offsets = [0, 0], sizes = [8, 8], strides = [1, 1]} : vector<16x8xf32> to vector<8x8xf32>
    %82 = vector.extract_strided_slice %72 {offsets = [8, 0], sizes = [8, 8], strides = [1, 1]} : vector<16x8xf32> to vector<8x8xf32>
    %83 = vector.extract_strided_slice %75 {offsets = [8, 0], sizes = [8, 8], strides = [1, 1]} : vector<16x8xf32> to vector<8x8xf32>
    %84 = vector.extract_strided_slice %78 {offsets = [8, 0], sizes = [8, 8], strides = [1, 1]} : vector<16x8xf32> to vector<8x8xf32>
    %85 = vector.shape_cast %34 : vector<8x8xf32> to vector<1x8x8xf32>
    %86 = vector.shape_cast %37 : vector<8x8xf32> to vector<1x8x8xf32>
    %87 = vector.shape_cast %49 : vector<8x8xf32> to vector<1x8x8xf32>
    %88 = vector.shape_cast %52 : vector<8x8xf32> to vector<1x8x8xf32>
    %89 = vector.shape_cast %64 : vector<8x8xf32> to vector<1x8x8xf32>
    %90 = vector.shape_cast %67 : vector<8x8xf32> to vector<1x8x8xf32>
    %91 = vector.shape_cast %79 : vector<8x8xf32> to vector<1x8x8xf32>
    %92 = vector.shape_cast %82 : vector<8x8xf32> to vector<1x8x8xf32>
    %93 = tpu.concatenate %85, %86, %87, %88, %89, %90, %91, %92 in 0 : vector<1x8x8xf32>, vector<1x8x8xf32>, vector<1x8x8xf32>, vector<1x8x8xf32>, vector<1x8x8xf32>, vector<1x8x8xf32>, vector<1x8x8xf32>, vector<1x8x8xf32> -> vector<8x8x8xf32>
    %94 = vector.shape_cast %35 : vector<8x8xf32> to vector<1x8x8xf32>
    %95 = vector.shape_cast %38 : vector<8x8xf32> to vector<1x8x8xf32>
    %96 = vector.shape_cast %50 : vector<8x8xf32> to vector<1x8x8xf32>
    %97 = vector.shape_cast %53 : vector<8x8xf32> to vector<1x8x8xf32>
    %98 = vector.shape_cast %65 : vector<8x8xf32> to vector<1x8x8xf32>
    %99 = vector.shape_cast %68 : vector<8x8xf32> to vector<1x8x8xf32>
    %100 = vector.shape_cast %80 : vector<8x8xf32> to vector<1x8x8xf32>
    %101 = vector.shape_cast %83 : vector<8x8xf32> to vector<1x8x8xf32>
    %102 = tpu.concatenate %94, %95, %96, %97, %98, %99, %100, %101 in 0 : vector<1x8x8xf32>, vector<1x8x8xf32>, vector<1x8x8xf32>, vector<1x8x8xf32>, vector<1x8x8xf32>, vector<1x8x8xf32>, vector<1x8x8xf32>, vector<1x8x8xf32> -> vector<8x8x8xf32>
    %103 = vector.shape_cast %36 : vector<8x8xf32> to vector<1x8x8xf32>
    %104 = vector.shape_cast %39 : vector<8x8xf32> to vector<1x8x8xf32>
    %105 = vector.shape_cast %51 : vector<8x8xf32> to vector<1x8x8xf32>
    %106 = vector.shape_cast %54 : vector<8x8xf32> to vector<1x8x8xf32>
    %107 = vector.shape_cast %66 : vector<8x8xf32> to vector<1x8x8xf32>
    %108 = vector.shape_cast %69 : vector<8x8xf32> to vector<1x8x8xf32>
    %109 = vector.shape_cast %81 : vector<8x8xf32> to vector<1x8x8xf32>
    %110 = vector.shape_cast %84 : vector<8x8xf32> to vector<1x8x8xf32>
    %111 = tpu.concatenate %103, %104, %105, %106, %107, %108, %109, %110 in 0 : vector<1x8x8xf32>, vector<1x8x8xf32>, vector<1x8x8xf32>, vector<1x8x8xf32>, vector<1x8x8xf32>, vector<1x8x8xf32>, vector<1x8x8xf32>, vector<1x8x8xf32> -> vector<8x8x8xf32>
    "tpu.trace_start"() <{level = 10 : i32, message = "bld,bmd->blm"}> : () -> ()
    %cst_54 = arith.constant dense<0.000000e+00> : vector<8x8x8xf32>
    %112 = tpu.matmul %93, %102, %cst_54 {dimension_numbers = #tpu.dot_dimension_numbers<[2], [2], [1], [1], [0, 0, 0, 1, 1, 1], [0], [0]>} : vector<8x8x8xf32>, vector<8x8x8xf32>, vector<8x8x8xf32> -> vector<8x8x8xf32>
    "tpu.trace_stop"() : () -> ()
    %cst_55 = arith.constant dense<0xFF800000> : vector<8x8xf32>
    %113 = vector.multi_reduction <maximumf>, %112, %cst_55 [2] : vector<8x8x8xf32> to vector<8x8xf32>
    %114 = vector.shape_cast %113 : vector<8x8xf32> to vector<8x8x1xf32>
    %115 = vector.broadcast %114 : vector<8x8x1xf32> to vector<8x8x8xf32>
    %116 = arith.subf %112, %115 : vector<8x8x8xf32>
    %117 = math.exp %116 : vector<8x8x8xf32>
    %cst_56 = arith.constant dense<0.000000e+00> : vector<8x8xf32>
    %118 = vector.multi_reduction <add>, %117, %cst_56 [2] : vector<8x8x8xf32> to vector<8x8xf32>
    %119 = vector.shape_cast %118 : vector<8x8xf32> to vector<8x8x1xf32>
    %120 = tpu.reciprocal %119 : vector<8x8x1xf32> -> vector<8x8x1xf32>
    %121 = vector.broadcast %120 : vector<8x8x1xf32> to vector<8x8x8xf32>
    %122 = arith.mulf %117, %121 : vector<8x8x8xf32>
    "tpu.trace_start"() <{level = 10 : i32, message = "blm,bmd->bld"}> : () -> ()
    %cst_57 = arith.constant dense<0.000000e+00> : vector<8x8x8xf32>
    %123 = tpu.matmul %122, %111, %cst_57 {dimension_numbers = #tpu.dot_dimension_numbers<[2], [1], [1], [2], [0, 0, 0, 1, 1, 2], [0], [0]>} : vector<8x8x8xf32>, vector<8x8x8xf32>, vector<8x8x8xf32> -> vector<8x8x8xf32>
    "tpu.trace_stop"() : () -> ()
    %124 = vector.extract_strided_slice %123 {offsets = [0, 0, 0], sizes = [1, 8, 8], strides = [1, 1, 1]} : vector<8x8x8xf32> to vector<1x8x8xf32>
    %125 = vector.shape_cast %124 : vector<1x8x8xf32> to vector<8x8xf32>
    %126 = vector.extract_strided_slice %123 {offsets = [1, 0, 0], sizes = [1, 8, 8], strides = [1, 1, 1]} : vector<8x8x8xf32> to vector<1x8x8xf32>
    %127 = vector.shape_cast %126 : vector<1x8x8xf32> to vector<8x8xf32>
    %128 = tpu.concatenate %125, %127 in 0 : vector<8x8xf32>, vector<8x8xf32> -> vector<16x8xf32>
    %c0_58 = arith.constant 0 : index
    %c0_59 = arith.constant 0 : index
    %c0_60 = arith.constant 0 : index
    %129 = vector.load %arg4[%c0_58, %c0_59, %c0_60] : memref<4x8x32xf32, #tpu.memory_space<vmem>>, vector<1x8x32xf32>
    %130 = vector.shape_cast %129 : vector<1x8x32xf32> to vector<8x32xf32>
    %cst_61 = arith.constant dense<0.000000e+00> : vector<16x32xf32>
    %131 = tpu.matmul %128, %130, %cst_61 {dimension_numbers = #tpu.dot_dimension_numbers<[1], [0], [0], [1], [0, 0, 1, 1], [], []>} : vector<16x8xf32>, vector<8x32xf32>, vector<16x32xf32> -> vector<16x32xf32>
    %132 = vector.extract_strided_slice %123 {offsets = [2, 0, 0], sizes = [1, 8, 8], strides = [1, 1, 1]} : vector<8x8x8xf32> to vector<1x8x8xf32>
    %133 = vector.shape_cast %132 : vector<1x8x8xf32> to vector<8x8xf32>
    %134 = vector.extract_strided_slice %123 {offsets = [3, 0, 0], sizes = [1, 8, 8], strides = [1, 1, 1]} : vector<8x8x8xf32> to vector<1x8x8xf32>
    %135 = vector.shape_cast %134 : vector<1x8x8xf32> to vector<8x8xf32>
    %136 = tpu.concatenate %133, %135 in 0 : vector<8x8xf32>, vector<8x8xf32> -> vector<16x8xf32>
    %c1_62 = arith.constant 1 : index
    %c0_63 = arith.constant 0 : index
    %c0_64 = arith.constant 0 : index
    %137 = vector.load %arg4[%c1_62, %c0_63, %c0_64] : memref<4x8x32xf32, #tpu.memory_space<vmem>>, vector<1x8x32xf32>
    %138 = vector.shape_cast %137 : vector<1x8x32xf32> to vector<8x32xf32>
    %cst_65 = arith.constant dense<0.000000e+00> : vector<16x32xf32>
    %139 = tpu.matmul %136, %138, %cst_65 {dimension_numbers = #tpu.dot_dimension_numbers<[1], [0], [0], [1], [0, 0, 1, 1], [], []>} : vector<16x8xf32>, vector<8x32xf32>, vector<16x32xf32> -> vector<16x32xf32>
    %140 = arith.addf %131, %139 : vector<16x32xf32>
    %141 = vector.extract_strided_slice %123 {offsets = [4, 0, 0], sizes = [1, 8, 8], strides = [1, 1, 1]} : vector<8x8x8xf32> to vector<1x8x8xf32>
    %142 = vector.shape_cast %141 : vector<1x8x8xf32> to vector<8x8xf32>
    %143 = vector.extract_strided_slice %123 {offsets = [5, 0, 0], sizes = [1, 8, 8], strides = [1, 1, 1]} : vector<8x8x8xf32> to vector<1x8x8xf32>
    %144 = vector.shape_cast %143 : vector<1x8x8xf32> to vector<8x8xf32>
    %145 = tpu.concatenate %142, %144 in 0 : vector<8x8xf32>, vector<8x8xf32> -> vector<16x8xf32>
    %c2_66 = arith.constant 2 : index
    %c0_67 = arith.constant 0 : index
    %c0_68 = arith.constant 0 : index
    %146 = vector.load %arg4[%c2_66, %c0_67, %c0_68] : memref<4x8x32xf32, #tpu.memory_space<vmem>>, vector<1x8x32xf32>
    %147 = vector.shape_cast %146 : vector<1x8x32xf32> to vector<8x32xf32>
    %cst_69 = arith.constant dense<0.000000e+00> : vector<16x32xf32>
    %148 = tpu.matmul %145, %147, %cst_69 {dimension_numbers = #tpu.dot_dimension_numbers<[1], [0], [0], [1], [0, 0, 1, 1], [], []>} : vector<16x8xf32>, vector<8x32xf32>, vector<16x32xf32> -> vector<16x32xf32>
    %149 = arith.addf %140, %148 : vector<16x32xf32>
    %150 = vector.extract_strided_slice %123 {offsets = [6, 0, 0], sizes = [1, 8, 8], strides = [1, 1, 1]} : vector<8x8x8xf32> to vector<1x8x8xf32>
    %151 = vector.shape_cast %150 : vector<1x8x8xf32> to vector<8x8xf32>
    %152 = vector.extract_strided_slice %123 {offsets = [7, 0, 0], sizes = [1, 8, 8], strides = [1, 1, 1]} : vector<8x8x8xf32> to vector<1x8x8xf32>
    %153 = vector.shape_cast %152 : vector<1x8x8xf32> to vector<8x8xf32>
    %154 = tpu.concatenate %151, %153 in 0 : vector<8x8xf32>, vector<8x8xf32> -> vector<16x8xf32>
    %c3_70 = arith.constant 3 : index
    %c0_71 = arith.constant 0 : index
    %c0_72 = arith.constant 0 : index
    %155 = vector.load %arg4[%c3_70, %c0_71, %c0_72] : memref<4x8x32xf32, #tpu.memory_space<vmem>>, vector<1x8x32xf32>
    %156 = vector.shape_cast %155 : vector<1x8x32xf32> to vector<8x32xf32>
    %cst_73 = arith.constant dense<0.000000e+00> : vector<16x32xf32>
    %157 = tpu.matmul %154, %156, %cst_73 {dimension_numbers = #tpu.dot_dimension_numbers<[1], [0], [0], [1], [0, 0, 1, 1], [], []>} : vector<16x8xf32>, vector<8x32xf32>, vector<16x32xf32> -> vector<16x32xf32>
    %158 = arith.addf %149, %157 : vector<16x32xf32>
    %c0_74 = arith.constant 0 : index
    %c0_75 = arith.constant 0 : index
    %159 = vector.load %arg7[%c0_74, %c0_75] : memref<1x32xf32, #tpu.memory_space<vmem>>, vector<1x32xf32>
    %c0_76 = arith.constant 0 : index
    %c0_77 = arith.constant 0 : index
    %160 = vector.load %arg8[%c0_76, %c0_77] : memref<1x32xf32, #tpu.memory_space<vmem>>, vector<1x32xf32>
    %cst_78 = arith.constant dense<0.000000e+00> : vector<16xf32>
    %161 = vector.multi_reduction <add>, %158, %cst_78 [1] : vector<16x32xf32> to vector<16xf32>
    %162 = vector.shape_cast %161 : vector<16xf32> to vector<16x1xf32>
    %163 = arith.mulf %158, %158 : vector<16x32xf32>
    %cst_79 = arith.constant dense<0.000000e+00> : vector<16xf32>
    %164 = vector.multi_reduction <add>, %163, %cst_79 [1] : vector<16x32xf32> to vector<16xf32>
    %165 = vector.shape_cast %164 : vector<16xf32> to vector<16x1xf32>
    %cst_80 = arith.constant 3.125000e-02 : f32
    %166 = vector.broadcast %cst_80 : f32 to vector<16x1xf32>
    %167 = arith.mulf %162, %166 : vector<16x1xf32>
    %cst_81 = arith.constant 3.125000e-02 : f32
    %168 = vector.broadcast %cst_81 : f32 to vector<16x1xf32>
    %169 = arith.mulf %165, %168 : vector<16x1xf32>
    %170 = arith.mulf %167, %167 : vector<16x1xf32>
    %171 = arith.subf %169, %170 : vector<16x1xf32>
    %172 = vector.broadcast %167 : vector<16x1xf32> to vector<16x32xf32>
    %173 = arith.subf %158, %172 : vector<16x32xf32>
    %cst_82 = arith.constant 9.99999974E-6 : f32
    %174 = vector.broadcast %cst_82 : f32 to vector<16x1xf32>
    %175 = arith.addf %171, %174 : vector<16x1xf32>
    %176 = math.rsqrt %175 : vector<16x1xf32>
    %177 = vector.broadcast %176 : vector<16x1xf32> to vector<16x32xf32>
    %178 = arith.mulf %173, %177 : vector<16x32xf32>
    %179 = vector.broadcast %159 : vector<1x32xf32> to vector<16x32xf32>
    %180 = arith.mulf %178, %179 : vector<16x32xf32>
    %181 = vector.broadcast %160 : vector<1x32xf32> to vector<16x32xf32>
    %182 = arith.addf %180, %181 : vector<16x32xf32>
    %183 = arith.addf %0, %182 : vector<16x32xf32>
    %c0_83 = arith.constant 0 : index
    %c0_84 = arith.constant 0 : index
    %184 = vector.load %arg9[%c0_83, %c0_84] : memref<1x32xf32, #tpu.memory_space<vmem>>, vector<1x32xf32>
    %c0_85 = arith.constant 0 : index
    %c0_86 = arith.constant 0 : index
    %185 = vector.load %arg10[%c0_85, %c0_86] : memref<1x32xf32, #tpu.memory_space<vmem>>, vector<1x32xf32>
    %cst_87 = arith.constant dense<0.000000e+00> : vector<16xf32>
    %186 = vector.multi_reduction <add>, %183, %cst_87 [1] : vector<16x32xf32> to vector<16xf32>
    %187 = vector.shape_cast %186 : vector<16xf32> to vector<16x1xf32>
    %188 = arith.mulf %183, %183 : vector<16x32xf32>
    %cst_88 = arith.constant dense<0.000000e+00> : vector<16xf32>
    %189 = vector.multi_reduction <add>, %188, %cst_88 [1] : vector<16x32xf32> to vector<16xf32>
    %190 = vector.shape_cast %189 : vector<16xf32> to vector<16x1xf32>
    %cst_89 = arith.constant 3.125000e-02 : f32
    %191 = vector.broadcast %cst_89 : f32 to vector<16x1xf32>
    %192 = arith.mulf %187, %191 : vector<16x1xf32>
    %cst_90 = arith.constant 3.125000e-02 : f32
    %193 = vector.broadcast %cst_90 : f32 to vector<16x1xf32>
    %194 = arith.mulf %190, %193 : vector<16x1xf32>
    %195 = arith.mulf %192, %192 : vector<16x1xf32>
    %196 = arith.subf %194, %195 : vector<16x1xf32>
    %197 = vector.broadcast %192 : vector<16x1xf32> to vector<16x32xf32>
    %198 = arith.subf %183, %197 : vector<16x32xf32>
    %cst_91 = arith.constant 9.99999974E-6 : f32
    %199 = vector.broadcast %cst_91 : f32 to vector<16x1xf32>
    %200 = arith.addf %196, %199 : vector<16x1xf32>
    %201 = math.rsqrt %200 : vector<16x1xf32>
    %202 = vector.broadcast %201 : vector<16x1xf32> to vector<16x32xf32>
    %203 = arith.mulf %198, %202 : vector<16x32xf32>
    %204 = vector.broadcast %184 : vector<1x32xf32> to vector<16x32xf32>
    %205 = arith.mulf %203, %204 : vector<16x32xf32>
    %206 = vector.broadcast %185 : vector<1x32xf32> to vector<16x32xf32>
    %207 = arith.addf %205, %206 : vector<16x32xf32>
    %c0_92 = arith.constant 0 : index
    %c0_93 = arith.constant 0 : index
    %208 = vector.load %arg11[%c0_92, %c0_93] : memref<32x256xf32, #tpu.memory_space<vmem>>, vector<32x256xf32>
    %cst_94 = arith.constant dense<0.000000e+00> : vector<16x256xf32>
    %209 = tpu.matmul %207, %208, %cst_94 {dimension_numbers = #tpu.dot_dimension_numbers<[1], [0], [0], [1], [0, 0, 1, 1], [], []>} : vector<16x32xf32>, vector<32x256xf32>, vector<16x256xf32> -> vector<16x256xf32>
    %210 = vector.extract_strided_slice %209 {offsets = [0, 0], sizes = [16, 128], strides = [1, 1]} : vector<16x256xf32> to vector<16x128xf32>
    %211 = vector.extract_strided_slice %209 {offsets = [0, 128], sizes = [16, 128], strides = [1, 1]} : vector<16x256xf32> to vector<16x128xf32>
    %212 = arith.negf %211 : vector<16x128xf32>
    %213 = math.exp %212 : vector<16x128xf32>
    %cst_95 = arith.constant 1.000000e+00 : f32
    %214 = vector.broadcast %cst_95 : f32 to vector<16x128xf32>
    %215 = arith.addf %214, %213 : vector<16x128xf32>
    %216 = arith.divf %214, %215 : vector<16x128xf32>
    %217 = arith.mulf %211, %216 : vector<16x128xf32>
    %218 = arith.mulf %210, %217 : vector<16x128xf32>
    %c0_96 = arith.constant 0 : index
    %c0_97 = arith.constant 0 : index
    %219 = vector.load %arg12[%c0_96, %c0_97] : memref<1x128xf32, #tpu.memory_space<vmem>>, vector<1x128xf32>
    %c0_98 = arith.constant 0 : index
    %c0_99 = arith.constant 0 : index
    %220 = vector.load %arg13[%c0_98, %c0_99] : memref<1x128xf32, #tpu.memory_space<vmem>>, vector<1x128xf32>
    %cst_100 = arith.constant dense<0.000000e+00> : vector<16xf32>
    %221 = vector.multi_reduction <add>, %218, %cst_100 [1] : vector<16x128xf32> to vector<16xf32>
    %222 = vector.shape_cast %221 : vector<16xf32> to vector<16x1xf32>
    %223 = arith.mulf %218, %218 : vector<16x128xf32>
    %cst_101 = arith.constant dense<0.000000e+00> : vector<16xf32>
    %224 = vector.multi_reduction <add>, %223, %cst_101 [1] : vector<16x128xf32> to vector<16xf32>
    %225 = vector.shape_cast %224 : vector<16xf32> to vector<16x1xf32>
    %cst_102 = arith.constant 7.812500e-03 : f32
    %226 = vector.broadcast %cst_102 : f32 to vector<16x1xf32>
    %227 = arith.mulf %222, %226 : vector<16x1xf32>
    %cst_103 = arith.constant 7.812500e-03 : f32
    %228 = vector.broadcast %cst_103 : f32 to vector<16x1xf32>
    %229 = arith.mulf %225, %228 : vector<16x1xf32>
    %230 = arith.mulf %227, %227 : vector<16x1xf32>
    %231 = arith.subf %229, %230 : vector<16x1xf32>
    %232 = vector.broadcast %227 : vector<16x1xf32> to vector<16x128xf32>
    %233 = arith.subf %218, %232 : vector<16x128xf32>
    %cst_104 = arith.constant 9.99999974E-6 : f32
    %234 = vector.broadcast %cst_104 : f32 to vector<16x1xf32>
    %235 = arith.addf %231, %234 : vector<16x1xf32>
    %236 = math.rsqrt %235 : vector<16x1xf32>
    %237 = vector.broadcast %236 : vector<16x1xf32> to vector<16x128xf32>
    %238 = arith.mulf %233, %237 : vector<16x128xf32>
    %239 = vector.broadcast %219 : vector<1x128xf32> to vector<16x128xf32>
    %240 = arith.mulf %238, %239 : vector<16x128xf32>
    %241 = vector.broadcast %220 : vector<1x128xf32> to vector<16x128xf32>
    %242 = arith.addf %240, %241 : vector<16x128xf32>
    %c0_105 = arith.constant 0 : index
    %c0_106 = arith.constant 0 : index
    %243 = vector.load %arg14[%c0_105, %c0_106] : memref<128x32xf32, #tpu.memory_space<vmem>>, vector<128x32xf32>
    %cst_107 = arith.constant dense<0.000000e+00> : vector<16x32xf32>
    %244 = tpu.matmul %242, %243, %cst_107 {dimension_numbers = #tpu.dot_dimension_numbers<[1], [0], [0], [1], [0, 0, 1, 1], [], []>} : vector<16x128xf32>, vector<128x32xf32>, vector<16x32xf32> -> vector<16x32xf32>
    %245 = arith.addf %183, %244 : vector<16x32xf32>
    %246 = vector.extract_strided_slice %245 {offsets = [0, 0], sizes = [4, 32], strides = [1, 1]} : vector<16x32xf32> to vector<4x32xf32>
    %247 = vector.extract_strided_slice %245 {offsets = [4, 0], sizes = [4, 32], strides = [1, 1]} : vector<16x32xf32> to vector<4x32xf32>
    %248 = vector.extract_strided_slice %245 {offsets = [8, 0], sizes = [4, 32], strides = [1, 1]} : vector<16x32xf32> to vector<4x32xf32>
    %249 = vector.extract_strided_slice %245 {offsets = [12, 0], sizes = [4, 32], strides = [1, 1]} : vector<16x32xf32> to vector<4x32xf32>
    %250 = tpu.concatenate %246, %247, %248, %249 in 1 : vector<4x32xf32>, vector<4x32xf32>, vector<4x32xf32>, vector<4x32xf32> -> vector<4x128xf32>
    %c0_108 = arith.constant 0 : index
    %c0_109 = arith.constant 0 : index
    %251 = vector.load %arg15[%c0_108, %c0_109] : memref<4x128xf32, #tpu.memory_space<vmem>>, vector<4x128xf32>
    tpu.vector_store %arg15[%c0_108, %c0_109], %250 {strides = array<i32>} : memref<4x128xf32, #tpu.memory_space<vmem>>, vector<4x128xf32>,
    return
  }
}

</mosaic_0001>

<bundles_post_ra>
// kernel: transformer_block.1
= control target key start
LH: loop header
LB: loop body
LE: loop exit
PB: predicated region body
PF: predicated region fallthrough
CT: control target
= control target key end

     0   :  { %vm54_vm0 = vcmask 261120   ;;  %vm452_vm7 = vcmask 64512   ;;  %s2298_s0 = inlined_call_operand.vmem [shape: f32[16,32], index: 0, kind: input, shape index: {}]   ;;  %s2299_s5 = inlined_call_operand.vmem [shape: f32[1,32], index: 5, kind: input, shape index: {}]   ;;  %s2300_s6 = inlined_call_operand.vmem [shape: f32[1,32], index: 6, kind: input, shape index: {}]   ;;  %s2301_s1 = inlined_call_operand.vmem [shape: f32[4,32,8], index: 1, kind: input, shape index: {}]   ;;  %s2302_s2 = inlined_call_operand.vmem [shape: f32[4,32,8], index: 2, kind: input, shape index: {}]   ;;  %s2303_s3 = inlined_call_operand.vmem [shape: f32[4,32,8], index: 3, kind: input, shape index: {}]   ;;  %s2304_s4 = inlined_call_operand.vmem [shape: f32[4,8,32], index: 4, kind: input, shape index: {}]   ;;  %s2305_s7 = inlined_call_operand.vmem [shape: f32[1,32], index: 7, kind: input, shape index: {}]   ;;  %s2306_s8 = inlined_call_operand.vmem [shape: f32[1,32], index: 8, kind: input, shape index: {}]   ;;  %s2307_s9 = inlined_call_operand.vmem [shape: f32[1,32], index: 9, kind: input, shape index: {}]   ;;  %s2308_s10 = inlined_call_operand.vmem [shape: f32[1,32], index: 10, kind: input, shape index: {}]   ;;  %s2309_s11 = inlined_call_operand.vmem [shape: f32[32,256], index: 11, kind: input, shape index: {}]   ;;  %s2310_s12 = inlined_call_operand.vmem [shape: f32[1,128], index: 12, kind: input, shape index: {}]   ;;  %s2311_s13 = inlined_call_operand.vmem [shape: f32[1,128], index: 13, kind: input, shape index: {}]   ;;  %s2312_s14 = inlined_call_operand.vmem [shape: f32[128,32], index: 14, kind: input, shape index: {}]   ;;  %s2313_s15 = inlined_call_operand.vmem [shape: f32[4,128], index: 15, kind: output, shape index: {}]  }
   0x1   :  { %v1764_v0 = vld [vmem:[%s2298_s0 + $0x8] sm:$0xff]  ;;  %v1769_v1 = vld [vmem:[%s2298_s0] sm:$0xff]  ;;  %v116_v10 = vld [vmem:[%s2301_s1 + $0x18] sm:$0xff] }
   0x2   :  { %v58_v2 = vsel %vm54_vm0, %v1764_v0, 0.0  ;;  %v55_v3 = vsel %vm54_vm0, %v1769_v1, 0.0  ;;  %v62_v4 = vmul.f32 %v1764_v0, %v1764_v0  ;;  %v61_v5 = vmul.f32 %v1769_v1, %v1769_v1  ;;  %v149_v11 = vld [vmem:[%s2302_s2 + $0x18] sm:$0xff]  ;;  %135 = vmatpush.msra.mxu0 %v116_v10  ;;  %v115_v14 = vld [vmem:[%s2301_s1 + $0x10] sm:$0xff]  ;;  %v114_v19 = vld [vmem:[%s2301_s1 + $0x8] sm:$0xff] }
   0x3   :  { %59 = vadd.xlane.f32.xlu1 %v58_v2  ;;  %56 = vadd.xlane.f32.xlu0 %v55_v3  ;;  %v176_v12 = vld [vmem:[%s2303_s3 + $0x18] sm:$0xff]  ;;  %v148_v15 = vld [vmem:[%s2302_s2 + $0x10] sm:$0xff]  ;;  %v147_v20 = vld [vmem:[%s2302_s2 + $0x8] sm:$0xff] }
   0x4   :  { %v66_v6 = vsel %vm54_vm0, %v62_v4, 0.0  ;;  %v63_v7 = vsel %vm54_vm0, %v61_v5, 0.0  ;;  %162 = vmatpush.msra.mxu1 %v149_v11  ;;  %v1535_v13 = vld [vmem:[%s2301_s1 + $0x58] sm:$0xff]  ;;  %189 = vmatpush.msra.mxu3 %v176_v12  ;;  %v175_v16 = vld [vmem:[%s2303_s3 + $0x10] sm:$0xff]  ;;  %v174_v21 = vld [vmem:[%s2303_s3 + $0x8] sm:$0xff] }
   0x5   :  { %301 = vmatpush.msra.mxu2 %v1535_v13  ;;  %136 = vmatpush.msra.mxu0 %v115_v14  ;;  %v1534_v18 = vld [vmem:[%s2301_s1 + $0x50] sm:$0xff]  ;;  %v1533_v23 = vld [vmem:[%s2301_s1 + $0x48] sm:$0xff]  ;;  %v113_v24 = vld [vmem:[%s2301_s1] sm:$0xff] }
   0x6   :  { %163 = vmatpush.msra.mxu1 %v148_v15  ;;  %190 = vmatpush.msra.mxu3 %v175_v16  ;;  %v146_v25 = vld [vmem:[%s2302_s2] sm:$0xff]  ;;  %v1517_v38 = vld [vmem:[%s2301_s1 + $0x38] sm:$0xff]  ;;  %v1516_v42 = vld [vmem:[%s2301_s1 + $0x30] sm:$0xff] }
   0x7   :  { %302 = vmatpush.msra.mxu2 %v1534_v18  ;;  %137 = vmatpush.msra.mxu0 %v114_v19  ;;  %v173_v26 = vld [vmem:[%s2303_s3] sm:$0xff]  ;;  %v1523_v39 = vld [vmem:[%s2302_s2 + $0x38] sm:$0xff]  ;;  %v1522_v43 = vld [vmem:[%s2302_s2 + $0x30] sm:$0xff] }
   0x8   :  { %164 = vmatpush.msra.mxu1 %v147_v20  ;;  %191 = vmatpush.msra.mxu3 %v174_v21  ;;  %v1532_v28 = vld [vmem:[%s2301_s1 + $0x40] sm:$0xff]  ;;  %v1529_v40 = vld [vmem:[%s2303_s3 + $0x38] sm:$0xff]  ;;  %v1528_v44 = vld [vmem:[%s2303_s3 + $0x30] sm:$0xff] }
   0x9   :  { %303 = vmatpush.msra.mxu2 %v1533_v23  ;;  %138 = vmatpush.msra.mxu0 %v113_v24  ;;  %v1559_v41 = vld [vmem:[%s2302_s2 + $0x78] sm:$0xff]  ;;  %v1558_v45 = vld [vmem:[%s2302_s2 + $0x70] sm:$0xff]  ;;  %v1515_v46 = vld [vmem:[%s2301_s1 + $0x28] sm:$0xff] }
   0xa   :  { %165 = vmatpush.msra.mxu1 %v146_v25  ;;  %192 = vmatpush.msra.mxu3 %v173_v26  ;;  %v1521_v47 = vld [vmem:[%s2302_s2 + $0x28] sm:$0xff]  ;;  %v1514_v51 = vld [vmem:[%s2301_s1 + $0x20] sm:$0xff]  ;;  %v1541_v13 = vld [vmem:[%s2302_s2 + $0x58] sm:$0xff] }
   0xb   :  { %67 = vadd.xlane.f32.xlu1 %v66_v6  ;;  %64 = vadd.xlane.f32.xlu0 %v63_v7  ;;  %v1527_v48 = vld [vmem:[%s2303_s3 + $0x28] sm:$0xff]  ;;  %v1520_v52 = vld [vmem:[%s2302_s2 + $0x20] sm:$0xff]  ;;  %v1547_v14 = vld [vmem:[%s2303_s3 + $0x58] sm:$0xff] }
   0xc   :  { %304 = vmatpush.msra.mxu2 %v1532_v28  ;;  %217 = vmatpush.msrb.mxu3 %v1517_v38  ;;  %v1557_v49 = vld [vmem:[%s2302_s2 + $0x68] sm:$0xff]  ;;  %v1526_v55 = vld [vmem:[%s2303_s3 + $0x20] sm:$0xff]  ;;  %v1553_v15 = vld [vmem:[%s2301_s1 + $0x78] sm:$0xff] }
   0xd   :  { %245 = vmatpush.msrb.mxu0 %v1523_v39  ;;  %273 = vmatpush.msrb.mxu1 %v1529_v40  ;;  %v1556_v56 = vld [vmem:[%s2302_s2 + $0x60] sm:$0xff]  ;;  %v1546_v16 = vld [vmem:[%s2303_s3 + $0x50] sm:$0xff]  ;;  %v1539_v19 = vld [vmem:[%s2302_s2 + $0x48] sm:$0xff] }
   0xe   :  { %413 = vmatpush.msrb.mxu2 %v1559_v41  ;;  %218 = vmatpush.msrb.mxu3 %v1516_v42  ;;  %v1612_v5 = vld [vmem:[%s2299_s5] ss:$0 sm:$0xff]  ;;  %v1552_v18 = vld [vmem:[%s2301_s1 + $0x70] sm:$0xff]  ;;  %v1545_v20 = vld [vmem:[%s2303_s3 + $0x48] sm:$0xff] }
   0xf   :  { %246 = vmatpush.msrb.mxu0 %v1522_v43  ;;  %274 = vmatpush.msrb.mxu1 %v1528_v44  ;;  %v1613_v7 = vld [vmem:[%s2300_s6] ss:$0 sm:$0xff]  ;;  %v1551_v21 = vld [vmem:[%s2301_s1 + $0x68] sm:$0xff]  ;;  %v1565_v26 = vld [vmem:[%s2303_s3 + $0x78] sm:$0xff] }
  0x10   :  { %414 = vmatpush.msrb.mxu2 %v1558_v45  ;;  %219 = vmatpush.msrb.mxu3 %v1515_v46  ;;  %v1538_v23 = vld [vmem:[%s2302_s2 + $0x40] sm:$0xff]  ;;  %v1563_v28 = vld [vmem:[%s2303_s3 + $0x68] sm:$0xff] }
  0x11   :  { %247 = vmatpush.msrb.mxu0 %v1521_v47  ;;  %275 = vmatpush.msrb.mxu1 %v1527_v48  ;;  %v1544_v24 = vld [vmem:[%s2303_s3 + $0x40] sm:$0xff] }
  0x12   :  { %415 = vmatpush.msrb.mxu2 %v1557_v49  ;;  %220 = vmatpush.msrb.mxu3 %v1514_v51  ;;  %v1550_v25 = vld [vmem:[%s2301_s1 + $0x60] sm:$0xff]  ;;  %s1680_s1 = smov 96  }
  0x13   :  { %248 = vmatpush.msrb.mxu0 %v1520_v52  ;;  %276 = vmatpush.msrb.mxu1 %v1526_v55 }
  0x14   :  { %416 = vmatpush.msrb.mxu2 %v1556_v56 }
  0x76   :  { %v60_v8 = vpop.xlane.xlu1 %59  ;;  %v57_v9 = vpop.xlane.xlu0 %56 }
  0x77   :  { %v1802_v17 = vmul.f32 0.03125, %v60_v8  ;;  %v1816_v22 = vmul.f32 0.03125, %v57_v9 }
  0x79   :  { %v74_v27 = vmul.f32 %v1802_v17, %v1802_v17  ;;  %v73_v31 = vmul.f32 %v1816_v22, %v1816_v22  ;;  %v77_v4 = vsub.f32 %v1769_v1, %v1816_v22  ;;  %v78_v10 = vsub.f32 %v1764_v0, %v1802_v17  ;;  %v1540_v0 = vld [vmem:[%s2302_s2 + $0x50] sm:$0xff] }
  0x7e   :  { %v68_v29 = vpop.xlane.xlu1 %67  ;;  %v65_v30 = vpop.xlane.xlu0 %64 }
  0x7f   :  { %v72_v32 = vmul.f32 0.03125, %v68_v29  ;;  %v71_v33 = vmul.f32 0.03125, %v65_v30  ;;  %v1562_v29 = vld [vmem:[%s2303_s3 + $0x60] sm:$0xff] }
  0x81   :  { %v76_v34 = vsub.f32 %v72_v32, %v74_v27  ;;  %v75_v35 = vsub.f32 %v71_v33, %v73_v31  ;;  %v1564_v27 = vld [vmem:[%s2303_s3 + $0x70] sm:$0xff] }
  0x83   :  { %v80_v36 = vadd.f32 1e-05, %v76_v34  ;;  %v79_v37 = vadd.f32 1e-05, %v75_v35 }
  0x85   :  { %1620 = vrsqrt.f32 %v80_v36  ;;  %vm87_vm3 = vweird.f32 %v79_v37  ;;  %vm97_vm5 = vweird.f32 %v80_v36 }
  0x86   :  { %1622 = vrsqrt.f32 %v79_v37 }
  0x8b   :  { %v1621_v50 = vpop.eup %1620 }
  0x8c   :  { %v1623_v53 = vpop.eup %1622  ;;  %v92_v54 = vmul.f32 %v1621_v50, %v80_v36  ;;  %vm98_vm2 = vweird.f32 %v1621_v50 }
  0x8d   :  { %v82_v57 = vmul.f32 %v1623_v53, %v79_v37  ;;  %vm88_vm1 = vweird.f32 %v1623_v53  ;;  %vm99_vm6 = vmor %vm97_vm5, %vm98_vm2 }
  0x8e   :  { %v93_v58 = vmul.f32 %v1621_v50, %v92_v54  ;;  %vm89_vm4 = vmor %vm87_vm3, %vm88_vm1 }
  0x8f   :  { %v83_v59 = vmul.f32 %v1623_v53, %v82_v57 }
  0x90   :  { %v94_v60 = vmul.f32 0.5, %v93_v58 }
  0x91   :  { %v84_v61 = vmul.f32 0.5, %v83_v59 }
  0x92   :  { %v95_v62 = vsub.f32 1.5, %v94_v60 }
  0x93   :  { %v85_v63 = vsub.f32 1.5, %v84_v61 }
  0x94   :  { %v96_v2 = vmul.f32 %v1621_v50, %v95_v62 }
  0x95   :  { %v86_v3 = vmul.f32 %v1623_v53, %v85_v63 }
  0x96   :  { %v100_v9 = vsel %vm99_vm6, %v1621_v50, %v96_v2 }
  0x97   :  { %v90_v6 = vsel %vm89_vm4, %v1623_v53, %v86_v3  ;;  %v102_v12 = vmul.f32 %v100_v9, %v78_v10 }
  0x98   :  { %v101_v8 = vmul.f32 %v90_v6, %v77_v4 }
  0x99   :  { %v107_v17 = vmul.f32 %v1612_v5, %v102_v12 }
  0x9a   :  { %v106_v11 = vmul.f32 %v1612_v5, %v101_v8 }
  0x9b   :  { %v112_v22 = vadd.f32 %v1613_v7, %v107_v17 }
  0x9c   :  { %v111_v1 = vadd.f32 %v1613_v7, %v106_v11 }
  0x9e   :  { %1508 = vmatmul.msk.f32.vlgmr.msra.gmra.mxu0 %vm54_vm0, %v111_v1  ;;  %1510 = vmatmul.msk.f32.vlgmr.msra.gmra.mxu1 %vm54_vm0, %v111_v1 }
  0x9f   :  { %1512 = vmatmul.msk.f32.vlgmr.msra.gmra.mxu3 %vm54_vm0, %v111_v1  ;;  %1536 = vmatmul.msk.f32.vlgmr.msra.gmra.mxu2 %vm54_vm0, %v111_v1 }
  0xa0   :  { %329 = vmatpush.msra.mxu3 %v1541_v13  ;;  %357 = vmatpush.msra.mxu0 %v1547_v14 }
  0xa1   :  { %385 = vmatpush.msra.mxu1 %v1553_v15 }
  0xa2   :  { %330 = vmatpush.msra.mxu3 %v1540_v0  ;;  %358 = vmatpush.msra.mxu0 %v1546_v16 }
  0xa3   :  { %386 = vmatpush.msra.mxu1 %v1552_v18 }
  0xa4   :  { %331 = vmatpush.msra.mxu3 %v1539_v19  ;;  %359 = vmatpush.msra.mxu0 %v1545_v20 }
  0xa5   :  { %387 = vmatpush.msra.mxu1 %v1551_v21 }
  0xa6   :  { %1509 = vmatmul.msk.f32.gmra.mxu0 %vm54_vm0, %v112_v22  ;;  %1511 = vmatmul.msk.f32.gmra.mxu1 %vm54_vm0, %v112_v22 }
  0xa7   :  { %1513 = vmatmul.msk.f32.gmra.mxu3 %vm54_vm0, %v112_v22  ;;  %1537 = vmatmul.msk.f32.gmra.mxu2 %vm54_vm0, %v112_v22 }
  0xa8   :  { %332 = vmatpush.msra.mxu3 %v1538_v23  ;;  %360 = vmatpush.msra.mxu0 %v1544_v24 }
  0xa9   :  { %388 = vmatpush.msra.mxu1 %v1550_v25 }
  0xae   :  { %1524 = vmatmul.msk.f32.vlgmr.msrb.gmra.mxu0 %vm54_vm0, %v111_v1  ;;  %1530 = vmatmul.msk.f32.vlgmr.msrb.gmra.mxu1 %vm54_vm0, %v111_v1 }
  0xaf   :  { %1518 = vmatmul.msk.f32.vlgmr.msrb.gmra.mxu3 %vm54_vm0, %v111_v1  ;;  %1560 = vmatmul.msk.f32.vlgmr.msrb.gmra.mxu2 %vm54_vm0, %v111_v1 }
  0xb0   :  { %441 = vmatpush.msrb.mxu3 %v1565_v26 }
  0xb2   :  { %442 = vmatpush.msrb.mxu3 %v1564_v27 }
  0xb4   :  { %443 = vmatpush.msrb.mxu3 %v1563_v28 }
  0xb6   :  { %1525 = vmatmul.msk.f32.gmra.mxu0 %vm54_vm0, %v112_v22  ;;  %1531 = vmatmul.msk.f32.gmra.mxu1 %vm54_vm0, %v112_v22 }
  0xb7   :  { %1519 = vmatmul.msk.f32.gmra.mxu3 %vm54_vm0, %v112_v22  ;;  %1561 = vmatmul.msk.f32.gmra.mxu2 %vm54_vm0, %v112_v22 }
  0xb8   :  { %444 = vmatpush.msrb.mxu3 %v1562_v29 }
  0xbe   :  { %1548 = vmatmul.msk.f32.vlgmr.msra.gmra.mxu0 %vm54_vm0, %v111_v1  ;;  %1554 = vmatmul.msk.f32.vlgmr.msra.gmra.mxu1 %vm54_vm0, %v111_v1 }
  0xbf   :  { %1542 = vmatmul.msk.f32.vlgmr.msra.gmra.mxu3 %vm54_vm0, %v111_v1 }
  0xc6   :  { %1549 = vmatmul.msk.f32.gmra.mxu0 %vm54_vm0, %v112_v22  ;;  %1555 = vmatmul.msk.f32.gmra.mxu1 %vm54_vm0, %v112_v22 }
  0xc7   :  { %1543 = vmatmul.msk.f32.gmra.mxu3 %vm54_vm0, %v112_v22 }
  0xcf   :  { %1566 = vmatmul.msk.f32.vlgmr.msrb.gmra.mxu3 %vm54_vm0, %v111_v1 }
  0xd7   :  { %1567 = vmatmul.msk.f32.gmra.mxu3 %vm54_vm0, %v112_v22 }
 0x11b   :  { %v140_v30 = vpop.f32.mrf.mxu0  ;;  %v167_v31 = vpop.f32.mrf.mxu1 }
 0x11c   :  { %1568 = vmatpush.xpose.msk.msrb.mxu0 %vm452_vm7, %v167_v31 }
 0x11f   :  { %1569 = vmatmul.msk.f32.vlgmr.msrb.gmra.mxu0 %vm452_vm7, %v140_v30 }
 0x122   :  { %v194_v32 = vpop.f32.mrf.mxu3  ;;  %v306_v33 = vpop.f32.mrf.mxu2 }
 0x123   :  { %v143_v34 = vpop.f32.mrf.mxu0  ;;  %v170_v35 = vpop.f32.mrf.mxu1 }
 0x124   :  { %1570 = vmatpush.xpose.msk.msrb.mxu1 %vm452_vm7, %v170_v35 }
 0x127   :  { %1571 = vmatmul.msk.f32.vlgmr.msrb.gmra.mxu1 %vm452_vm7, %v143_v34 }
 0x12a   :  { %v197_v36 = vpop.f32.mrf.mxu3  ;;  %v309_v37 = vpop.f32.mrf.mxu2 }
 0x12b   :  { %v250_v38 = vpop.f32.mrf.mxu0  ;;  %v278_v39 = vpop.f32.mrf.mxu1 }
 0x12c   :  { %1572 = vmatpush.xpose.msk.msra.mxu2 %vm452_vm7, %v250_v38 }
 0x132   :  { %v222_v40 = vpop.f32.mrf.mxu3  ;;  %v418_v41 = vpop.f32.mrf.mxu2 }
 0x133   :  { %1573 = vmatmul.msk.f32.vlgmr.msra.gmra.mxu2 %vm452_vm7, %v222_v40  ;;  %v253_v42 = vpop.f32.mrf.mxu0  ;;  %v281_v43 = vpop.f32.mrf.mxu1 }
 0x134   :  { %1580 = vmatpush.xpose.msk.msrb.mxu2 %vm452_vm7, %v418_v41  ;;  %1574 = vmatpush.xpose.msk.msra.mxu3 %vm452_vm7, %v253_v42 }
 0x138   :  { %917 = vmatpush.msra.mxu2 %v278_v39 }
 0x13a   :  { %v225_v44 = vpop.f32.mrf.mxu3  ;;  %v421_v45 = vpop.f32.mrf.mxu2 }
 0x13b   :  { %1575 = vmatmul.msk.f32.vlgmr.msra.gmra.mxu3 %vm452_vm7, %v225_v44  ;;  %v390_v46 = vpop.f32.mrf.mxu1  ;;  %v362_v49 = vpop.f32.mrf.mxu0 }
 0x13c   :  { %1582 = vmatpush.xpose.msk.msrb.mxu3 %vm452_vm7, %v421_v45  ;;  %1581 = vmatmul.msk.f32.vlgmr.msrb.gmra.mxu2 %vm452_vm7, %v390_v46 }
 0x140   :  { %940 = vmatpush.msra.mxu3 %v281_v43 }
 0x142   :  { %v334_v47 = vpop.f32.mrf.mxu3 }
 0x143   :  { %1576 = vmatpush.xpose.msk.msra.mxu0 %vm452_vm7, %v334_v47  ;;  %v393_v48 = vpop.f32.mrf.mxu1  ;;  %v365_v51 = vpop.f32.mrf.mxu0 }
 0x144   :  { %1583 = vmatmul.msk.f32.vlgmr.msrb.gmra.mxu3 %vm452_vm7, %v393_v48 }
 0x146   :  { %1577 = vmatmul.msk.f32.vlgmr.msra.gmra.mxu0 %vm452_vm7, %v306_v33 }
 0x147   :  { %871 = vmatpush.msrb.mxu0 %v194_v32 }
 0x149   :  { %963 = vmatpush.msra.mxu0 %v362_v49 }
 0x14a   :  { %v337_v50 = vpop.f32.mrf.mxu3 }
 0x14b   :  { %1578 = vmatpush.xpose.msk.msra.mxu1 %vm452_vm7, %v337_v50 }
 0x14e   :  { %1579 = vmatmul.msk.f32.vlgmr.msra.gmra.mxu1 %vm452_vm7, %v309_v37 }
 0x14f   :  { %894 = vmatpush.msrb.mxu1 %v197_v36 }
 0x151   :  { %986 = vmatpush.msra.mxu1 %v365_v51 }
 0x152   :  { %v446_v52 = vpop.f32.mrf.mxu3 }
 0x153   :  { %1009 = vmatpush.msrb.mxu2 %v446_v52 }
 0x15a   :  { %v449_v53 = vpop.f32.mrf.mxu3 }
 0x15b   :  { %1032 = vmatpush.msrb.mxu3 %v449_v53 }
 0x19c   :  { %v476_v56 = vpop.f32.mrf.mxu0 }
 0x19d   :  { %v661_v60 = vsel %vm452_vm7, %v476_v56, -inf }
 0x1a4   :  { %v502_v62 = vpop.f32.mrf.mxu1 }
 0x1a5   :  { %v664_v3 = vsel %vm452_vm7, %v502_v62, -inf }
 0x1b6   :  { %v528_v54 = vpop.f32.mrf.mxu2 }
 0x1b7   :  { %v667_v55 = vsel %vm452_vm7, %v528_v54, -inf }
 0x1b8   :  { %668 = vmax.xlane.f32.xlu2 %v667_v55 }
 0x1be   :  { %v554_v57 = vpop.f32.mrf.mxu3 }
 0x1bf   :  { %v632_v58 = vpop.f32.mrf.mxu2  ;;  %v670_v59 = vsel %vm452_vm7, %v554_v57, -inf }
 0x1c0   :  { %671 = vmax.xlane.f32.xlu0 %v670_v59  ;;  %662 = vmax.xlane.f32.xlu2 %v661_v60  ;;  %v679_v61 = vsel %vm452_vm7, %v632_v58, -inf }
 0x1c1   :  { %680 = vmax.xlane.f32.xlu1 %v679_v61 }
 0x1c3   :  { %v580_v63 = vpop.f32.mrf.mxu0 }
 0x1c4   :  { %v673_v4 = vsel %vm452_vm7, %v580_v63, -inf }
 0x1c7   :  { %v658_v2 = vpop.f32.mrf.mxu3 }
 0x1c8   :  { %665 = vmax.xlane.f32.xlu2 %v664_v3  ;;  %674 = vmax.xlane.f32.xlu0 %v673_v4  ;;  %v682_v5 = vsel %vm452_vm7, %v658_v2, -inf }
 0x1c9   :  { %683 = vmax.xlane.f32.xlu1 %v682_v5 }
 0x1cb   :  { %v606_v6 = vpop.f32.mrf.mxu1 }
 0x1cc   :  { %v676_v7 = vsel %vm452_vm7, %v606_v6, -inf }
 0x1d0   :  { %677 = vmax.xlane.f32.xlu2 %v676_v7 }
 0x22b   :  { %v669_v8 = vpop.xlane.xlu2 %668 }
 0x22c   :  { %v687_v9 = vsub.f32 %v528_v54, %v669_v8 }
 0x22e   :  { %v697_v10 = vmul.f32 1.442695, %v687_v9 }
 0x230   :  { %1624 = vpow2.f32 %v697_v10 }
 0x233   :  { %v672_v11 = vpop.xlane.xlu0 %671  ;;  %v663_v12 = vpop.xlane.xlu2 %662 }
 0x234   :  { %v688_v1 = vsub.f32 %v554_v57, %v672_v11  ;;  %v685_v13 = vsub.f32 %v476_v56, %v663_v12  ;;  %v681_v14 = vpop.xlane.xlu1 %680 }
 0x235   :  { %v691_v15 = vsub.f32 %v632_v58, %v681_v14 }
 0x236   :  { %v1991_v0 = vpop.eup %1624  ;;  %v699_v16 = vmul.f32 1.442695, %v688_v1  ;;  %v693_v17 = vmul.f32 1.442695, %v685_v13 }
 0x237   :  { %v705_v18 = vmul.f32 1.442695, %v691_v15  ;;  %v715_v19 = vsel %vm452_vm7, %v1991_v0, 0.0 }
 0x238   :  { %1626 = vpow2.f32 %v699_v16  ;;  %716 = vadd.xlane.f32.xlu0 %v715_v19 }
 0x239   :  { %1628 = vpow2.f32 %v693_v17 }
 0x23a   :  { %1630 = vpow2.f32 %v705_v18 }
 0x23b   :  { %v666_v20 = vpop.xlane.xlu2 %665  ;;  %v675_v21 = vpop.xlane.xlu0 %674 }
 0x23c   :  { %v686_v22 = vsub.f32 %v502_v62, %v666_v20  ;;  %v689_v23 = vsub.f32 %v580_v63, %v675_v21  ;;  %v684_v24 = vpop.xlane.xlu1 %683 }
 0x23d   :  { %v692_v25 = vsub.f32 %v658_v2, %v684_v24 }
 0x23e   :  { %v1995_v26 = vpop.eup %1626  ;;  %v695_v27 = vmul.f32 1.442695, %v686_v22  ;;  %v701_v28 = vmul.f32 1.442695, %v689_v23 }
 0x23f   :  { %v1997_v29 = vpop.eup %1628  ;;  %v707_v30 = vmul.f32 1.442695, %v692_v25  ;;  %v718_v31 = vsel %vm452_vm7, %v1995_v26, 0.0 }
 0x240   :  { %v2001_v32 = vpop.eup %1630  ;;  %1632 = vpow2.f32 %v695_v27  ;;  %719 = vadd.xlane.f32.xlu2 %v718_v31  ;;  %v709_v33 = vsel %vm452_vm7, %v1997_v29, 0.0  ;;  %v1597_v27 = vld [vmem:[%s2304_s4 + $0x10] sm:$0xff] }
 0x241   :  { %1634 = vpow2.f32 %v701_v28  ;;  %710 = vadd.xlane.f32.xlu1 %v709_v33  ;;  %v727_v34 = vsel %vm452_vm7, %v2001_v32, 0.0 }
 0x242   :  { %1636 = vpow2.f32 %v707_v30  ;;  %728 = vadd.xlane.f32.xlu0 %v727_v34 }
 0x243   :  { %v678_v35 = vpop.xlane.xlu2 %677 }
 0x244   :  { %v690_v36 = vsub.f32 %v606_v6, %v678_v35 }
 0x246   :  { %v2007_v37 = vpop.eup %1632  ;;  %v703_v38 = vmul.f32 1.442695, %v690_v36 }
 0x247   :  { %v2009_v39 = vpop.eup %1634  ;;  %v712_v40 = vsel %vm452_vm7, %v2007_v37, 0.0 }
 0x248   :  { %v2013_v41 = vpop.eup %1636  ;;  %1638 = vpow2.f32 %v703_v38  ;;  %v721_v42 = vsel %vm452_vm7, %v2009_v39, 0.0 }
 0x249   :  { %713 = vadd.xlane.f32.xlu1 %v712_v40  ;;  %722 = vadd.xlane.f32.xlu2 %v721_v42  ;;  %v730_v43 = vsel %vm452_vm7, %v2013_v41, 0.0 }
 0x24a   :  { %731 = vadd.xlane.f32.xlu0 %v730_v43 }
 0x24e   :  { %v2019_v44 = vpop.eup %1638 }
 0x24f   :  { %v724_v45 = vsel %vm452_vm7, %v2019_v44, 0.0 }
 0x251   :  { %725 = vadd.xlane.f32.xlu1 %v724_v45 }
 0x2ab   :  { %v717_v46 = vpop.xlane.xlu0 %716 }
 0x2ac   :  { %1640 = vrcp.f32 %v717_v46  ;;  %v770_v53 = vand.u32 2147483647, %v717_v46  ;;  %v772_v54 = vand.u32 2147483648, %v717_v46  ;;  %vm766_vm8 = vweird.f32 %v717_v46 }
 0x2ae   :  { %vm2028_vm10 = vcmp.eq.f32.partialorder %v770_v53, 8.507059e+37  ;;  %v773_v60 = vor.u32 1.1754944e-38, %v772_v54 }
 0x2b2   :  { %v2023_v47 = vpop.eup %1640 }
 0x2b3   :  { %v762_v48 = vmul.f32 %v2023_v47, %v717_v46  ;;  %v720_v49 = vpop.xlane.xlu2 %719  ;;  %vm767_vm9 = vweird.f32 %v2023_v47 }
 0x2b4   :  { %v711_v50 = vpop.xlane.xlu1 %710  ;;  %1642 = vrcp.f32 %v720_v49  ;;  %v784_v57 = vand.u32 2147483647, %v720_v49  ;;  %vm780_vm11 = vweird.f32 %v720_v49  ;;  %v786_v3 = vand.u32 2147483648, %v720_v49  ;;  %vm2051_vm15 = vmor %vm766_vm8, %vm767_vm9 }
 0x2b5   :  { %v763_v51 = vsub.f32 1.0, %v762_v48  ;;  %1644 = vrcp.f32 %v711_v50  ;;  %v729_v52 = vpop.xlane.xlu0 %728  ;;  %vm738_vm12 = vweird.f32 %v711_v50  ;;  %v742_v2 = vand.u32 2147483647, %v711_v50 }
 0x2b6   :  { %1646 = vrcp.f32 %v729_v52  ;;  %v744_v10 = vand.u32 2147483648, %v711_v50  ;;  %vm2041_vm13 = vcmp.eq.f32.partialorder %v784_v57, 8.507059e+37  ;;  %v826_v12 = vand.u32 2147483647, %v729_v52 }
 0x2b7   :  { %v764_v55 = vmul.f32 %v2023_v47, %v763_v51  ;;  %v787_v17 = vor.u32 1.1754944e-38, %v786_v3  ;;  %v828_v18 = vand.u32 2147483648, %v729_v52  ;;  %vm2060_vm2 = vcmp.eq.f32.partialorder %v742_v2, 8.507059e+37 }
 0x2b8   :  { %vm822_vm4 = vweird.f32 %v729_v52  ;;  %v745_v28 = vor.u32 1.1754944e-38, %v744_v10  ;;  %vm2078_vm8 = vcmp.eq.f32.partialorder %v826_v12, 8.507059e+37 }
 0x2b9   :  { %v765_v6 = vadd.f32 %v2023_v47, %v764_v55  ;;  %v829_v36 = vor.u32 1.1754944e-38, %v828_v18 }
 0x2ba   :  { %v1643_v56 = vpop.eup %1642 }
 0x2bb   :  { %v1645_v58 = vpop.eup %1644  ;;  %v776_v61 = vmul.f32 %v1643_v56, %v720_v49  ;;  %vm781_vm14 = vweird.f32 %v1643_v56  ;;  %v769_v19 = vsel %vm2051_vm15, %v2023_v47, %v765_v6 }
 0x2bc   :  { %v2032_v62 = vpop.eup %1646  ;;  %v734_v63 = vmul.f32 %v1645_v58, %v711_v50  ;;  %v2034_v4 = vpop.xlane.xlu1 %713  ;;  %vm739_vm1 = vweird.f32 %v1645_v58  ;;  %vm2065_vm3 = vmor %vm780_vm11, %vm781_vm14  ;;  %v774_v34 = vsel %vm2028_vm10, %v773_v60, %v769_v19 }
 0x2bd   :  { %v2036_v5 = vpop.xlane.xlu2 %722  ;;  %v777_v7 = vsub.f32 1.0, %v776_v61  ;;  %v818_v8 = vmul.f32 %v2032_v62, %v729_v52  ;;  %1648 = vrcp.f32 %v2034_v4  ;;  %v2045_v1 = vpop.xlane.xlu0 %731  ;;  %vm823_vm5 = vweird.f32 %v2032_v62  ;;  %vm2071_vm6 = vmor %vm738_vm12, %vm739_vm1 }
 0x2be   :  { %v735_v9 = vsub.f32 1.0, %v734_v63  ;;  %1650 = vrcp.f32 %v2036_v5  ;;  %vm2092_vm9 = vmor %vm822_vm4, %vm823_vm5  ;;  %vm752_vm11 = vweird.f32 %v2034_v4  ;;  %v756_v46 = vand.u32 2147483647, %v2034_v4 }
 0x2bf   :  { %v778_v13 = vmul.f32 %v1643_v56, %v777_v7  ;;  %v819_v14 = vsub.f32 1.0, %v818_v8  ;;  %1652 = vrcp.f32 %v2045_v1  ;;  %v758_v47 = vand.u32 2147483648, %v2034_v4 }
 0x2c0   :  { %v736_v16 = vmul.f32 %v1645_v58, %v735_v9  ;;  %vm794_vm10 = vweird.f32 %v2036_v5  ;;  %v798_v53 = vand.u32 2147483647, %v2036_v5  ;;  %v847_v54 = vmul.f32 %v1991_v0, %v774_v34 }
 0x2c1   :  { %v779_v20 = vadd.f32 %v1643_v56, %v778_v13  ;;  %v820_v21 = vmul.f32 %v2032_v62, %v819_v14  ;;  %v800_v59 = vand.u32 2147483648, %v2036_v5  ;;  %vm757_vm15 = vcmp.eq.f32.partialorder %v756_v46, 8.507059e+37 }
 0x2c2   :  { %v737_v22 = vadd.f32 %v1645_v58, %v736_v16  ;;  %1586 = vmatmul.msk.f32.vlgmr.msra.gmra.mxu2 %vm452_vm7, %v847_v54  ;;  %v759_v2 = vor.u32 1.1754944e-38, %v758_v47  ;;  %v840_v3 = vand.u32 2147483647, %v2045_v1  ;;  %v842_v6 = vand.u32 2147483648, %v2045_v1 }
 0x2c3   :  { %v1649_v25 = vpop.eup %1648  ;;  %v783_v30 = vsel %vm2065_vm3, %v1643_v56, %v779_v20  ;;  %v821_v31 = vadd.f32 %v2032_v62, %v820_v21  ;;  %vm799_vm3 = vcmp.eq.f32.partialorder %v798_v53, 8.507059e+37  ;;  %vm836_vm4 = vweird.f32 %v2045_v1  ;;  %1121 = vmatpush.msra.mxu2 %v1597_v27  ;;  %v1676_v27 = vld [vmem:[%s2298_s0] sm:$0xff] }
 0x2c4   :  { %v741_v35 = vsel %vm2071_vm6, %v1645_v58, %v737_v22  ;;  %v748_v38 = vmul.f32 %v1649_v25, %v2034_v4  ;;  %v2087_v40 = vpop.xlane.xlu1 %725  ;;  %v1651_v42 = vpop.eup %1650  ;;  %v788_v43 = vsel %vm2041_vm13, %v787_v17, %v783_v30  ;;  %vm753_vm12 = vweird.f32 %v1649_v25 }
 0x2c5   :  { %v746_v48 = vsel %vm2060_vm2, %v745_v28, %v741_v35  ;;  %v825_v49 = vsel %vm2092_vm9, %v2032_v62, %v821_v31  ;;  %v790_v51 = vmul.f32 %v1651_v42, %v2036_v5  ;;  %v1653_v52 = vpop.eup %1652  ;;  %1654 = vrcp.f32 %v2087_v40  ;;  %vm754_vm14 = vmor %vm752_vm11, %vm753_vm12 }
 0x2c6   :  { %v749_v50 = vsub.f32 1.0, %v748_v38  ;;  %v832_v57 = vmul.f32 %v1653_v52, %v2045_v1  ;;  %v830_v58 = vsel %vm2078_vm8, %v829_v36, %v825_v49  ;;  %v845_v60 = vmul.f32 %v1997_v29, %v746_v48 }
 0x2c7   :  { %v791_v56 = vsub.f32 1.0, %v790_v51  ;;  %v848_v61 = vmul.f32 %v1995_v26, %v788_v43  ;;  %vm795_vm13 = vweird.f32 %v1651_v42  ;;  %vm837_vm1 = vweird.f32 %v1653_v52 }
 0x2c8   :  { %v750_v55 = vmul.f32 %v1649_v25, %v749_v50  ;;  %v833_v63 = vsub.f32 1.0, %v832_v57  ;;  %1584 = vmatmul.msk.f32.vlgmr.msrb.gmra.mxu0 %vm452_vm7, %v845_v60  ;;  %vm796_vm2 = vmor %vm794_vm10, %vm795_vm13  ;;  %v801_v4 = vor.u32 1.1754944e-38, %v800_v59  ;;  %v851_v10 = vmul.f32 %v2001_v32, %v830_v58 }
 0x2c9   :  { %v792_v0 = vmul.f32 %v1651_v42, %v791_v56  ;;  %1587 = vmatmul.msk.f32.vlgmr.msra.gmra.mxu3 %vm452_vm7, %v848_v61  ;;  %vm838_vm5 = vmor %vm836_vm4, %vm837_vm1  ;;  %v843_v15 = vor.u32 1.1754944e-38, %v842_v6  ;;  %vm841_vm6 = vcmp.eq.f32.partialorder %v840_v3, 8.507059e+37  ;;  %v814_v20 = vand.u32 2147483648, %v2087_v40 }
 0x2ca   :  { %v751_v62 = vadd.f32 %v1649_v25, %v750_v55  ;;  %v834_v26 = vmul.f32 %v1653_v52, %v833_v63  ;;  %1590 = vmatmul.msk.f32.vlgmr.msrb.gmra.mxu2 %vm452_vm7, %v851_v10  ;;  %v812_v1 = vand.u32 2147483647, %v2087_v40  ;;  %vm808_vm9 = vweird.f32 %v2087_v40 }
 0x2cb   :  { %v793_v7 = vadd.f32 %v1651_v42, %v792_v0  ;;  %v1655_v8 = vpop.eup %1654 }
 0x2cc   :  { %v755_v29 = vsel %vm754_vm14, %v1649_v25, %v751_v62  ;;  %v835_v12 = vadd.f32 %v1653_v52, %v834_v26  ;;  %v804_v13 = vmul.f32 %v1655_v8, %v2087_v40  ;;  %vm809_vm8 = vweird.f32 %v1655_v8  ;;  %v1037_v25 = vld [vmem:[%s2304_s4] sm:$0xff] }
 0x2cd   :  { %v760_v9 = vsel %vm757_vm15, %v759_v2, %v755_v29  ;;  %v797_v11 = vsel %vm796_vm2, %v1651_v42, %v793_v7  ;;  %vm810_vm11 = vmor %vm808_vm9, %vm809_vm8  ;;  %vm813_vm10 = vcmp.eq.f32.partialorder %v812_v1, 8.507059e+37 }
 0x2ce   :  { %v802_v14 = vsel %vm799_vm3, %v801_v4, %v797_v11  ;;  %v846_v16 = vmul.f32 %v2007_v37, %v760_v9  ;;  %v839_v17 = vsel %vm838_vm5, %v1653_v52, %v835_v12  ;;  %v805_v18 = vsub.f32 1.0, %v804_v13 }
 0x2cf   :  { %v849_v5 = vmul.f32 %v2009_v39, %v802_v14  ;;  %v844_v19 = vsel %vm841_vm6, %v843_v15, %v839_v17  ;;  %v815_v39 = vor.u32 1.1754944e-38, %v814_v20  ;;  %v1614_v20 = vld [vmem:[%s2305_s7] ss:$0 sm:$0xff] }
 0x2d0   :  { %1585 = vmatmul.msk.f32.vlgmr.msrb.gmra.mxu1 %vm452_vm7, %v846_v16  ;;  %v806_v32 = vmul.f32 %v1655_v8, %v805_v18  ;;  %v852_v21 = vmul.f32 %v2013_v41, %v844_v19  ;;  %v1592_v41 = vld [vmem:[%s2304_s4 + $0x8] sm:$0xff] }
 0x2d1   :  { %1588 = vmatmul.msk.f32.vlgmr.msra.gmra.mxu0 %vm452_vm7, %v849_v5  ;;  %1090 = vmatpush.msrb.mxu1 %v1037_v25 }
 0x2d2   :  { %v807_v37 = vadd.f32 %v1655_v8, %v806_v32  ;;  %1591 = vmatmul.msk.f32.vlgmr.msrb.gmra.mxu3 %vm452_vm7, %v852_v21  ;;  %1061 = vmatpush.msrb.mxu0 %v1592_v41 }
 0x2d4   :  { %v811_v22 = vsel %vm810_vm11, %v1655_v8, %v807_v37  ;;  %v1615_v37 = vld [vmem:[%s2306_s8] ss:$0 sm:$0xff] }
 0x2d5   :  { %v816_v23 = vsel %vm813_vm10, %v815_v39, %v811_v22 }
 0x2d6   :  { %v850_v24 = vmul.f32 %v2019_v44, %v816_v23  ;;  %v1600_v44 = vld [vmem:[%s2304_s4 + $0x18] sm:$0xff] }
 0x2d7   :  { %1154 = vmatpush.msra.mxu3 %v1600_v44 }
 0x2d8   :  { %1589 = vmatmul.msk.f32.vlgmr.msra.gmra.mxu1 %vm452_vm7, %v850_v24 }
 0x345   :  { %v873_v28 = vpop.f32.mrf.mxu0  ;;  %v919_v30 = vpop.f32.mrf.mxu2 }
 0x346   :  { %1595 = vmatmul.msk.f32.vlgmr.msrb.gmra.mxu1 %vm452_vm7, %v873_v28  ;;  %1593 = vmatmul.msk.f32.vlgmr.msrb.gmra.mxu0 %vm452_vm7, %v919_v30 }
 0x34c   :  { %v942_v34 = vpop.f32.mrf.mxu3 }
 0x34d   :  { %v896_v31 = vpop.f32.mrf.mxu1  ;;  %v1011_v35 = vpop.f32.mrf.mxu2 }
 0x34e   :  { %v965_v33 = vpop.f32.mrf.mxu0  ;;  %1596 = vmatmul.msk.f32.gmra.mxu1 %vm452_vm7, %v896_v31  ;;  %1594 = vmatmul.msk.f32.gmra.mxu0 %vm452_vm7, %v942_v34 }
 0x34f   :  { %1598 = vmatmul.msk.f32.vlgmr.msra.gmra.mxu2 %vm452_vm7, %v965_v33  ;;  %1601 = vmatmul.msk.f32.vlgmr.msra.gmra.mxu3 %vm452_vm7, %v1011_v35 }
 0x355   :  { %v988_v36 = vpop.f32.mrf.mxu1  ;;  %v1034_v38 = vpop.f32.mrf.mxu3 }
 0x357   :  { %1599 = vmatmul.msk.f32.gmra.mxu2 %vm452_vm7, %v988_v36  ;;  %1602 = vmatmul.msk.f32.gmra.mxu3 %vm452_vm7, %v1034_v38  ;;  %v1677_v38 = vld [vmem:[%s2298_s0 + $0x8] sm:$0xff] }
 0x3c3   :  { %v1092_v40 = vpop.f32.mrf.mxu1  ;;  %v1063_v42 = vpop.f32.mrf.mxu0 }
 0x3c4   :  { %v1093_v43 = vadd.f32 %v1092_v40, %v1063_v42 }
 0x3cb   :  { %v1095_v47 = vpop.f32.mrf.mxu1  ;;  %v1066_v50 = vpop.f32.mrf.mxu0 }
 0x3cc   :  { %v1096_v51 = vadd.f32 %v1095_v47, %v1066_v50  ;;  %v1293_v47 = vld [vmem:[%s2309_s11 + $0x38] sm:$0xff] }
 0x3cd   :  { %1335 = vmatpush.msra.mxu1 %v1293_v47 }
 0x3d2   :  { %v1123_v45 = vpop.f32.mrf.mxu2  ;;  %v1156_v48 = vpop.f32.mrf.mxu3 }
 0x3d3   :  { %v1129_v46 = vadd.f32 %v1123_v45, %v1093_v43 }
 0x3d5   :  { %v1162_v49 = vadd.f32 %v1156_v48, %v1129_v46  ;;  %v1292_v46 = vld [vmem:[%s2309_s11 + $0x30] sm:$0xff]  ;;  %v1290_v48 = vld [vmem:[%s2309_s11 + $0x20] sm:$0xff] }
 0x3d6   :  { %1312 = vmatpush.msra.mxu0 %v1292_v46 }
 0x3d7   :  { %v1166_v52 = vsel %vm54_vm0, %v1162_v49, 0.0  ;;  %v1172_v53 = vmul.f32 %v1162_v49, %v1162_v49 }
 0x3d8   :  { %1167 = vadd.xlane.f32.xlu2 %v1166_v52  ;;  %1313 = vmatpush.msra.mxu0 %v1290_v48  ;;  %v1289_v52 = vld [vmem:[%s2309_s11 + $0x18] sm:$0xff] }
 0x3d9   :  { %v1174_v56 = vsel %vm54_vm0, %v1172_v53, 0.0 }
 0x3da   :  { %v1126_v54 = vpop.f32.mrf.mxu2  ;;  %1175 = vadd.xlane.f32.xlu0 %v1174_v56  ;;  %v1159_v57 = vpop.f32.mrf.mxu3 }
 0x3db   :  { %v1130_v55 = vadd.f32 %v1126_v54, %v1096_v51  ;;  %v1288_v51 = vld [vmem:[%s2309_s11 + $0x10] sm:$0xff]  ;;  %v1286_v54 = vld [vmem:[%s2309_s11] sm:$0xff] }
 0x3dc   :  { %1314 = vmatpush.msra.mxu0 %v1288_v51 }
 0x3dd   :  { %v1163_v58 = vadd.f32 %v1159_v57, %v1130_v55  ;;  %v1287_v55 = vld [vmem:[%s2309_s11 + $0x8] sm:$0xff] }
 0x3de   :  { %1315 = vmatpush.msra.mxu0 %v1286_v54 }
 0x3df   :  { %v1169_v59 = vsel %vm54_vm0, %v1163_v58, 0.0  ;;  %v1173_v60 = vmul.f32 %v1163_v58, %v1163_v58 }
 0x3e0   :  { %1170 = vadd.xlane.f32.xlu1 %v1169_v59 }
 0x3e1   :  { %v1177_v61 = vsel %vm54_vm0, %v1173_v60, 0.0 }
 0x3e2   :  { %1178 = vadd.xlane.f32.xlu2 %v1177_v61 }
 0x44b   :  { %v1168_v62 = vpop.xlane.xlu2 %1167 }
 0x44c   :  { %v1180_v0 = vmul.f32 0.03125, %v1168_v62 }
 0x44d   :  { %v1176_v63 = vpop.xlane.xlu0 %1175 }
 0x44e   :  { %v1184_v2 = vmul.f32 %v1180_v0, %v1180_v0  ;;  %v1182_v3 = vmul.f32 0.03125, %v1176_v63  ;;  %v1188_v19 = vsub.f32 %v1162_v49, %v1180_v0  ;;  %v1291_v49 = vld [vmem:[%s2309_s11 + $0x28] sm:$0xff] }
 0x44f   :  { %1336 = vmatpush.msra.mxu1 %v1291_v49 }
 0x450   :  { %v1186_v6 = vsub.f32 %v1182_v3, %v1184_v2 }
 0x451   :  { %1337 = vmatpush.msra.mxu1 %v1289_v52 }
 0x452   :  { %v1190_v29 = vadd.f32 1e-05, %v1186_v6 }
 0x453   :  { %v1171_v7 = vpop.xlane.xlu1 %1170  ;;  %1338 = vmatpush.msra.mxu1 %v1287_v55 }
 0x454   :  { %1656 = vrsqrt.f32 %v1190_v29  ;;  %v1181_v26 = vmul.f32 0.03125, %v1171_v7  ;;  %vm1198_vm12 = vweird.f32 %v1190_v29 }
 0x455   :  { %v1179_v8 = vpop.xlane.xlu2 %1178 }
 0x456   :  { %v1185_v9 = vmul.f32 %v1181_v26, %v1181_v26  ;;  %v1183_v4 = vmul.f32 0.03125, %v1179_v8  ;;  %v1189_v25 = vsub.f32 %v1163_v58, %v1181_v26 }
 0x458   :  { %v1187_v10 = vsub.f32 %v1183_v4, %v1185_v9 }
 0x45a   :  { %v1657_v11 = vpop.eup %1656  ;;  %v1191_v12 = vadd.f32 1e-05, %v1187_v10 }
 0x45b   :  { %v1193_v13 = vmul.f32 %v1657_v11, %v1190_v29  ;;  %vm1199_vm7 = vweird.f32 %v1657_v11 }
 0x45c   :  { %1658 = vrsqrt.f32 %v1191_v12  ;;  %vm1200_vm13 = vmor %vm1198_vm12, %vm1199_vm7  ;;  %vm1208_vm15 = vweird.f32 %v1191_v12 }
 0x45d   :  { %v1194_v14 = vmul.f32 %v1657_v11, %v1193_v13  ;;  %v1616_v13 = vld [vmem:[%s2307_s9] ss:$0 sm:$0xff] }
 0x45f   :  { %v1195_v15 = vmul.f32 0.5, %v1194_v14 }
 0x461   :  { %v1196_v16 = vsub.f32 1.5, %v1195_v15 }
 0x462   :  { %v1659_v17 = vpop.eup %1658 }
 0x463   :  { %v1197_v18 = vmul.f32 %v1657_v11, %v1196_v16  ;;  %v1203_v5 = vmul.f32 %v1659_v17, %v1191_v12  ;;  %vm1209_vm14 = vweird.f32 %v1659_v17 }
 0x464   :  { %vm1210_vm1 = vmor %vm1208_vm15, %vm1209_vm14 }
 0x465   :  { %v1201_v32 = vsel %vm1200_vm13, %v1657_v11, %v1197_v18  ;;  %v1204_v1 = vmul.f32 %v1659_v17, %v1203_v5 }
 0x466   :  { %v1212_v21 = vmul.f32 %v1201_v32, %v1188_v19 }
 0x467   :  { %v1205_v39 = vmul.f32 0.5, %v1204_v1 }
 0x468   :  { %v1217_v22 = vmul.f32 %v1614_v20, %v1212_v21 }
 0x469   :  { %v1206_v23 = vsub.f32 1.5, %v1205_v39 }
 0x46a   :  { %v1222_v24 = vadd.f32 %v1615_v37, %v1217_v22 }
 0x46b   :  { %v1207_v41 = vmul.f32 %v1659_v17, %v1206_v23 }
 0x46c   :  { %v2173_v44 = vadd.f32 %v1676_v27, %v1222_v24 }
 0x46d   :  { %v1211_v28 = vsel %vm1210_vm1, %v1659_v17, %v1207_v41  ;;  %v1617_v17 = vld [vmem:[%s2308_s10] ss:$0 sm:$0xff] }
 0x46e   :  { %v1213_v30 = vmul.f32 %v1211_v28, %v1189_v25  ;;  %v1228_v31 = vsel %vm54_vm0, %v2173_v44, 0.0  ;;  %v1234_v33 = vmul.f32 %v2173_v44, %v2173_v44 }
 0x46f   :  { %1229 = vadd.xlane.f32.xlu0 %v1228_v31 }
 0x470   :  { %v1236_v34 = vsel %vm54_vm0, %v1234_v33, 0.0  ;;  %v1218_v35 = vmul.f32 %v1614_v20, %v1213_v30 }
 0x471   :  { %1237 = vadd.xlane.f32.xlu1 %v1236_v34 }
 0x472   :  { %v1223_v36 = vadd.f32 %v1615_v37, %v1218_v35 }
 0x474   :  { %v2183_v40 = vadd.f32 %v1677_v38, %v1223_v36 }
 0x476   :  { %v1231_v42 = vsel %vm54_vm0, %v2183_v40, 0.0  ;;  %v1235_v43 = vmul.f32 %v2183_v40, %v2183_v40 }
 0x477   :  { %1232 = vadd.xlane.f32.xlu2 %v1231_v42 }
 0x478   :  { %v1239_v45 = vsel %vm54_vm0, %v1235_v43, 0.0 }
 0x479   :  { %1240 = vadd.xlane.f32.xlu0 %v1239_v45 }
 0x4e2   :  { %v1230_v50 = vpop.xlane.xlu0 %1229 }
 0x4e3   :  { %v1242_v53 = vmul.f32 0.03125, %v1230_v50 }
 0x4e4   :  { %v1238_v56 = vpop.xlane.xlu1 %1237 }
 0x4e5   :  { %v1246_v57 = vmul.f32 %v1242_v53, %v1242_v53  ;;  %v1244_v58 = vmul.f32 0.03125, %v1238_v56  ;;  %v1250_v12 = vsub.f32 %v2173_v44, %v1242_v53 }
 0x4e7   :  { %v1248_v59 = vsub.f32 %v1244_v58, %v1246_v57 }
 0x4e9   :  { %v1252_v60 = vadd.f32 1e-05, %v1248_v59 }
 0x4ea   :  { %v1233_v61 = vpop.xlane.xlu2 %1232 }
 0x4eb   :  { %1660 = vrsqrt.f32 %v1252_v60  ;;  %v1243_v62 = vmul.f32 0.03125, %v1233_v61  ;;  %vm1260_vm3 = vweird.f32 %v1252_v60 }
 0x4ec   :  { %v1241_v0 = vpop.xlane.xlu0 %1240 }
 0x4ed   :  { %v1247_v63 = vmul.f32 %v1243_v62, %v1243_v62  ;;  %v1245_v2 = vmul.f32 0.03125, %v1241_v0  ;;  %v1251_v1 = vsub.f32 %v2183_v40, %v1243_v62 }
 0x4ef   :  { %v1249_v3 = vsub.f32 %v1245_v2, %v1247_v63 }
 0x4f1   :  { %v1661_v6 = vpop.eup %1660  ;;  %v1253_v29 = vadd.f32 1e-05, %v1249_v3  ;;  %v1459_v3 = vld [vmem:[%s2312_s14 + $0x78] sm:$0xff] }
 0x4f2   :  { %v1255_v7 = vmul.f32 %v1661_v6, %v1252_v60  ;;  %vm1261_vm2 = vweird.f32 %v1661_v6  ;;  %1460 = vmatpush.msrb.mxu2 %v1459_v3 }
 0x4f3   :  { %1662 = vrsqrt.f32 %v1253_v29  ;;  %vm1262_vm4 = vmor %vm1260_vm3, %vm1261_vm2  ;;  %vm1270_vm6 = vweird.f32 %v1253_v29 }
 0x4f4   :  { %v1256_v26 = vmul.f32 %v1661_v6, %v1255_v7  ;;  %v1456_v7 = vld [vmem:[%s2312_s14 + $0x60] sm:$0xff] }
 0x4f6   :  { %v1257_v8 = vmul.f32 0.5, %v1256_v26  ;;  %v1455_v26 = vld [vmem:[%s2312_s14 + $0x58] sm:$0xff] }
 0x4f8   :  { %v1258_v9 = vsub.f32 1.5, %v1257_v8  ;;  %v1454_v8 = vld [vmem:[%s2312_s14 + $0x50] sm:$0xff] }
 0x4f9   :  { %v1663_v4 = vpop.eup %1662 }
 0x4fa   :  { %v1259_v10 = vmul.f32 %v1661_v6, %v1258_v9  ;;  %v1265_v11 = vmul.f32 %v1663_v4, %v1253_v29  ;;  %vm1271_vm5 = vweird.f32 %v1663_v4  ;;  %v1457_v29 = vld [vmem:[%s2312_s14 + $0x68] sm:$0xff] }
 0x4fb   :  { %vm1272_vm8 = vmor %vm1270_vm6, %vm1271_vm5  ;;  %v1453_v9 = vld [vmem:[%s2312_s14 + $0x48] sm:$0xff] }
 0x4fc   :  { %v1263_v14 = vsel %vm1262_vm4, %v1661_v6, %v1259_v10  ;;  %v1266_v15 = vmul.f32 %v1663_v4, %v1265_v11  ;;  %v1458_v6 = vld [vmem:[%s2312_s14 + $0x70] sm:$0xff]  ;;  %v1451_v10 = vld [vmem:[%s2312_s14 + $0x38] sm:$0xff] }
 0x4fd   :  { %v1274_v16 = vmul.f32 %v1263_v14, %v1250_v12  ;;  %1461 = vmatpush.msrb.mxu2 %v1458_v6  ;;  %v1450_v11 = vld [vmem:[%s2312_s14 + $0x30] sm:$0xff]  ;;  %v1449_v12 = vld [vmem:[%s2312_s14 + $0x28] sm:$0xff]  ;;  %v1447_v14 = vld [vmem:[%s2312_s14 + $0x18] sm:$0xff] }
 0x4fe   :  { %v1267_v18 = vmul.f32 0.5, %v1266_v15  ;;  %v1446_v15 = vld [vmem:[%s2312_s14 + $0x10] sm:$0xff] }
 0x4ff   :  { %v1279_v5 = vmul.f32 %v1616_v13, %v1274_v16  ;;  %1462 = vmatpush.msrb.mxu2 %v1457_v29  ;;  %v1445_v16 = vld [vmem:[%s2312_s14 + $0x8] sm:$0xff] }
 0x500   :  { %v1268_v19 = vsub.f32 1.5, %v1267_v18 }
 0x501   :  { %v1284_v20 = vadd.f32 %v1617_v17, %v1279_v5  ;;  %1463 = vmatpush.msrb.mxu2 %v1456_v7  ;;  %v1444_v5 = vld [vmem:[%s2312_s14] sm:$0xff] }
 0x502   :  { %v1269_v32 = vmul.f32 %v1663_v4, %v1268_v19 }
 0x503   :  { %1603 = vmatmul.msk.f32.vlgmr.msra.gmra.mxu0 %vm54_vm0, %v1284_v20  ;;  %1605 = vmatmul.msk.f32.vlgmr.msra.gmra.mxu1 %vm54_vm0, %v1284_v20 }
 0x504   :  { %v1273_v21 = vsel %vm1272_vm8, %v1663_v4, %v1269_v32  ;;  %1464 = vmatpush.msrb.mxu2 %v1455_v26  ;;  %v1452_v4 = vld [vmem:[%s2312_s14 + $0x40] sm:$0xff]  ;;  %vm1499_vm8 = vcmask 523264  }
 0x505   :  { %v1275_v37 = vmul.f32 %v1273_v21, %v1251_v1 }
 0x506   :  { %1465 = vmatpush.msrb.mxu2 %v1454_v8 }
 0x507   :  { %v1280_v39 = vmul.f32 %v1616_v13, %v1275_v37  ;;  %v1448_v13 = vld [vmem:[%s2312_s14 + $0x20] sm:$0xff] }
 0x508   :  { %1466 = vmatpush.msrb.mxu2 %v1453_v9 }
 0x509   :  { %v1285_v22 = vadd.f32 %v1617_v17, %v1280_v39 }
 0x50a   :  { %1467 = vmatpush.msrb.mxu2 %v1452_v4 }
 0x50b   :  { %1604 = vmatmul.msk.f32.gmra.mxu0 %vm54_vm0, %v1285_v22  ;;  %1606 = vmatmul.msk.f32.gmra.mxu1 %vm54_vm0, %v1285_v22 }
 0x50c   :  { %1468 = vmatpush.msrb.mxu2 %v1451_v10 }
 0x50e   :  { %1469 = vmatpush.msrb.mxu2 %v1450_v11 }
 0x510   :  { %1470 = vmatpush.msrb.mxu2 %v1449_v12 }
 0x512   :  { %1471 = vmatpush.msrb.mxu2 %v1448_v13 }
 0x514   :  { %1472 = vmatpush.msrb.mxu2 %v1447_v14 }
 0x516   :  { %1473 = vmatpush.msrb.mxu2 %v1446_v15 }
 0x518   :  { %1474 = vmatpush.msrb.mxu2 %v1445_v16 }
 0x51a   :  { %1475 = vmatpush.msrb.mxu2 %v1444_v5 }
 0x580   :  { %v1340_v23 = vpop.f32.mrf.mxu1  ;;  %v1317_v49 = vpop.f32.mrf.mxu0 }
 0x581   :  { %v1607_v24 = vmul.f32 -1.442695, %v1340_v23 }
 0x583   :  { %1664 = vpow2.f32 %v1607_v24 }
 0x588   :  { %v1343_v41 = vpop.f32.mrf.mxu1  ;;  %v1320_v0 = vpop.f32.mrf.mxu0 }
 0x589   :  { %v1665_v25 = vpop.eup %1664  ;;  %v1608_v27 = vmul.f32 -1.442695, %v1343_v41 }
 0x58a   :  { %v1352_v28 = vadd.f32 1.0, %v1665_v25 }
 0x58b   :  { %1666 = vpow2.f32 %v1608_v27 }
 0x58c   :  { %1668 = vrcp.f32 %v1352_v28  ;;  %v1365_v36 = vand.u32 2147483648, %v1352_v28  ;;  %v1363_v42 = vand.u32 2147483647, %v1352_v28  ;;  %vm1359_vm11 = vweird.f32 %v1352_v28 }
 0x58e   :  { %v1366_v46 = vor.u32 1.1754944e-38, %v1365_v36  ;;  %vm1364_vm7 = vcmp.eq.f32.partialorder %v1363_v42, 8.507059e+37  ;;  %v1618_v42 = vld [vmem:[%s2310_s12] ss:$0 sm:$0xff]  ;;  %s1678_s12 = smov 32  }
 0x591   :  { %v1667_v30 = vpop.eup %1666 }
 0x592   :  { %v1669_v31 = vpop.eup %1668  ;;  %v1353_v33 = vadd.f32 1.0, %v1667_v30 }
 0x593   :  { %v1355_v34 = vmul.f32 %v1669_v31, %v1352_v28  ;;  %vm1360_vm9 = vweird.f32 %v1669_v31 }
 0x594   :  { %1670 = vrcp.f32 %v1353_v33  ;;  %vm1361_vm10 = vmor %vm1359_vm11, %vm1360_vm9  ;;  %v1380_v53 = vand.u32 2147483648, %v1353_v33  ;;  %v1378_v56 = vand.u32 2147483647, %v1353_v33  ;;  %vm1374_vm13 = vweird.f32 %v1353_v33 }
 0x595   :  { %v1356_v35 = vsub.f32 1.0, %v1355_v34  ;;  %vm1501_vm9 = vcmask 785408  }
 0x596   :  { %v1381_v59 = vor.u32 1.1754944e-38, %v1380_v53  ;;  %vm1379_vm15 = vcmp.eq.f32.partialorder %v1378_v56, 8.507059e+37 }
 0x597   :  { %v1357_v38 = vmul.f32 %v1669_v31, %v1356_v35 }
 0x599   :  { %v1358_v43 = vadd.f32 %v1669_v31, %v1357_v38 }
 0x59a   :  { %v1671_v45 = vpop.eup %1670 }
 0x59b   :  { %v1362_v47 = vsel %vm1361_vm10, %v1669_v31, %v1358_v43  ;;  %v1370_v48 = vmul.f32 %v1671_v45, %v1353_v33  ;;  %vm1375_vm12 = vweird.f32 %v1671_v45 }
 0x59c   :  { %v1367_v50 = vsel %vm1364_vm7, %v1366_v46, %v1362_v47  ;;  %vm1376_vm14 = vmor %vm1374_vm13, %vm1375_vm12  ;;  %v1619_v47 = vld [vmem:[%s2311_s13] ss:$0 sm:$0xff]  ;;  %s1679_s13 = smov 64  }
 0x59d   :  { %v1384_v51 = vmul.f32 %v1367_v50, %v1340_v23  ;;  %v1371_v52 = vsub.f32 1.0, %v1370_v48 }
 0x59f   :  { %v2226_v54 = vmul.f32 %v1384_v51, %v1317_v49  ;;  %v1372_v55 = vmul.f32 %v1671_v45, %v1371_v52 }
 0x5a1   :  { %v1373_v57 = vadd.f32 %v1671_v45, %v1372_v55  ;;  %1390 = vadd.xlane.f32.xlu1 %v2226_v54  ;;  %v1394_v58 = vmul.f32 %v2226_v54, %v2226_v54 }
 0x5a3   :  { %v1377_v60 = vsel %vm1376_vm14, %v1671_v45, %v1373_v57  ;;  %1396 = vadd.xlane.f32.xlu2 %v1394_v58 }
 0x5a4   :  { %v1382_v61 = vsel %vm1379_vm15, %v1381_v59, %v1377_v60 }
 0x5a5   :  { %v1385_v62 = vmul.f32 %v1382_v61, %v1343_v41 }
 0x5a7   :  { %v2231_v63 = vmul.f32 %v1385_v62, %v1320_v0 }
 0x5a9   :  { %1392 = vadd.xlane.f32.xlu0 %v2231_v63  ;;  %v1395_v2 = vmul.f32 %v2231_v63, %v2231_v63 }
 0x5ab   :  { %1398 = vadd.xlane.f32.xlu1 %v1395_v2 }
 0x614   :  { %v1391_v17 = vpop.xlane.xlu1 %1390 }
 0x615   :  { %v1400_v18 = vmul.f32 0.0078125, %v1391_v17 }
 0x616   :  { %v1397_v19 = vpop.xlane.xlu2 %1396 }
 0x617   :  { %v1404_v20 = vmul.f32 %v1400_v18, %v1400_v18  ;;  %v1402_v32 = vmul.f32 0.0078125, %v1397_v19  ;;  %v1408_v38 = vsub.f32 %v2226_v54, %v1400_v18 }
 0x619   :  { %v1406_v1 = vsub.f32 %v1402_v32, %v1404_v20 }
 0x61b   :  { %v1410_v21 = vadd.f32 1e-05, %v1406_v1 }
 0x61c   :  { %v1393_v37 = vpop.xlane.xlu0 %1392 }
 0x61d   :  { %1672 = vrsqrt.f32 %v1410_v21  ;;  %v1401_v39 = vmul.f32 0.0078125, %v1393_v37  ;;  %vm1418_vm2 = vweird.f32 %v1410_v21 }
 0x61e   :  { %v1399_v22 = vpop.xlane.xlu1 %1398 }
 0x61f   :  { %v1405_v23 = vmul.f32 %v1401_v39, %v1401_v39  ;;  %v1403_v24 = vmul.f32 0.0078125, %v1399_v22  ;;  %v1409_v53 = vsub.f32 %v2231_v63, %v1401_v39 }
 0x621   :  { %v1407_v41 = vsub.f32 %v1403_v24, %v1405_v23 }
 0x623   :  { %v1673_v25 = vpop.eup %1672  ;;  %v1411_v27 = vadd.f32 1e-05, %v1407_v41 }
 0x624   :  { %v1413_v28 = vmul.f32 %v1673_v25, %v1410_v21  ;;  %vm1419_vm1 = vweird.f32 %v1673_v25 }
 0x625   :  { %1674 = vrsqrt.f32 %v1411_v27  ;;  %vm1420_vm3 = vmor %vm1418_vm2, %vm1419_vm1  ;;  %vm1428_vm5 = vweird.f32 %v1411_v27 }
 0x626   :  { %v1414_v30 = vmul.f32 %v1673_v25, %v1413_v28 }
 0x628   :  { %v1415_v31 = vmul.f32 0.5, %v1414_v30 }
 0x62a   :  { %v1416_v33 = vsub.f32 1.5, %v1415_v31 }
 0x62b   :  { %v1675_v34 = vpop.eup %1674 }
 0x62c   :  { %v1417_v35 = vmul.f32 %v1673_v25, %v1416_v33  ;;  %v1423_v36 = vmul.f32 %v1675_v34, %v1411_v27  ;;  %vm1429_vm4 = vweird.f32 %v1675_v34 }
 0x62d   :  { %vm1430_vm6 = vmor %vm1428_vm5, %vm1429_vm4 }
 0x62e   :  { %v1421_v43 = vsel %vm1420_vm3, %v1673_v25, %v1417_v35  ;;  %v1424_v45 = vmul.f32 %v1675_v34, %v1423_v36 }
 0x62f   :  { %v1432_v46 = vmul.f32 %v1421_v43, %v1408_v38 }
 0x630   :  { %v1425_v48 = vmul.f32 0.5, %v1424_v45 }
 0x631   :  { %v1437_v49 = vmul.f32 %v1618_v42, %v1432_v46 }
 0x632   :  { %v1426_v50 = vsub.f32 1.5, %v1425_v48 }
 0x633   :  { %v1442_v51 = vadd.f32 %v1619_v47, %v1437_v49 }
 0x634   :  { %v1427_v52 = vmul.f32 %v1675_v34, %v1426_v50 }
 0x635   :  { %1476 = vmatmul.f32.vlgmr.msrb.gmra.mxu2 %v1442_v51 }
 0x636   :  { %v1431_v54 = vsel %vm1430_vm6, %v1675_v34, %v1427_v52 }
 0x637   :  { %v1433_v55 = vmul.f32 %v1431_v54, %v1409_v53 }
 0x639   :  { %v1438_v56 = vmul.f32 %v1618_v42, %v1433_v55 }
 0x63b   :  { %v1443_v57 = vadd.f32 %v1619_v47, %v1438_v56 }
 0x63d   :  { %1479 = vmatmul.f32.gmra.mxu2 %v1443_v57 }
 0x6b8   :  { %v1477_v58 = vpop.f32.mrf.mxu2 }
 0x6b9   :  { %v1483_v59 = vadd.f32 %v1477_v58, %v2173_v44 }
 0x6bb   :  { %v1486_v60 = vrot.slane %v1483_v59, 4 }
 0x6bd   :  { %1487 = vrot.lane.b32.xlu2 %v1486_v60, %s1678_s12 }
 0x6c0   :  { %v1480_v61 = vpop.f32.mrf.mxu2 }
 0x6c1   :  { %v1484_v62 = vadd.f32 %v1480_v61, %v2183_v40 }
 0x6c3   :  { %v1494_v0 = vrot.slane %v1484_v62, 4  ;;  %1491 = vrot.lane.b32.xlu0 %v1484_v62, %s1679_s13 }
 0x6c5   :  { %1495 = vrot.lane.b32.xlu1 %v1494_v0, %s1680_s1 }
 0x717   :  { %v1488_v63 = vpop.permute.xlu2 %1487 }
 0x718   :  { %v1498_v2 = vsel %vm54_vm0, %v1483_v59, %v1488_v63 }
 0x735   :  { %v1492_v3 = vpop.permute.xlu0 %1491 }
 0x736   :  { %v1500_v6 = vsel %vm1499_vm8, %v1498_v2, %v1492_v3 }
 0x737   :  { %v1496_v29 = vpop.permute.xlu1 %1495 }
 0x738   :  { %v1502_v44 = vsel %vm1501_vm9, %v1500_v6, %v1496_v29 }
 0x739   :  { %1503 = vst [vmem:[%s2313_s15] sm:$0xf] %v1502_v44 }

</bundles_post_ra>
